<compile_context>
chip_gen: v7x
topology: tpu7x:2x2x1
jax: 0.10.0
libtpu: 0.0.40
codegen_flags: <defaults>
</compile_context>

<pallas_src>
import jax
import jax.numpy as jnp
from jax.experimental import pallas as pl
from jax.experimental.pallas import tpu as pltpu

F32_EPS = float(jnp.finfo(jnp.float32).eps)
INV_STD = (1.0 + 1e-8) ** -0.5          # _normalize with default buffers (mean=0, var=1)


def make_policy_kernel(trunk_plan, head_sizes, fuse_first, actor_h1, critic_h1,
                       actor_in_size, critic_in_size):
    n_heads = len(head_sizes)
    sum_heads = sum(head_sizes)

    def kernel(*refs):
        it = iter(refs)
        x_ref = next(it)                      # (TB, D)   bf16
        masks_ref = next(it)                  # (TB, sum) int32
        if fuse_first:
            w1_ref, b1_ref = next(it), next(it)
        else:
            w1a_ref, b1a_ref, w1c_ref, b1c_ref = next(it), next(it), next(it), next(it)
        trunk_refs = [(next(it), next(it)) for _ in trunk_plan]
        whv_ref, bhv_ref = next(it), next(it)  # fused (heads | value) weight
        dep_refs = [next(it) for _ in range(n_heads - 1)]
        out_ref = next(it)

        x = x_ref[...]                        # bf16
        masks = masks_ref[...]                # int32
        tb = x.shape[0]

        # ---- first actor + critic layer (fused into one MXU pass when input slices match) ----
        if fuse_first:
            z1 = jnp.dot(x, w1_ref[...], preferred_element_type=jnp.float32) + b1_ref[...]
            h = jnp.maximum(z1[:, :actor_h1], 0.0)
            c = jnp.maximum(z1[:, actor_h1:actor_h1 + critic_h1], 0.0)
        else:
            h = jnp.maximum(jnp.dot(x[:, :actor_in_size], w1a_ref[...],
                                    preferred_element_type=jnp.float32) + b1a_ref[...], 0.0)
            c = jnp.maximum(jnp.dot(x[:, :critic_in_size], w1c_ref[...],
                                    preferred_element_type=jnp.float32) + b1c_ref[...], 0.0)

        # ---- remaining hidden layers: actor+critic in lockstep via block-diagonal weights ----
        for plan, (w_ref, b_ref) in zip(trunk_plan, trunk_refs):
            kind = plan[0]
            if kind == "both":
                a_out, c_out = plan[1], plan[2]
                hc = jnp.concatenate([h, c], axis=-1).astype(jnp.bfloat16)
                z = jnp.maximum(jnp.dot(hc, w_ref[...],
                                        preferred_element_type=jnp.float32) + b_ref[...], 0.0)
                h = z[:, :a_out]
                c = z[:, a_out:a_out + c_out]
            elif kind == "actor":
                h = jnp.maximum(jnp.dot(h.astype(jnp.bfloat16), w_ref[...],
                                        preferred_element_type=jnp.float32) + b_ref[...], 0.0)
            else:  # "critic"
                c = jnp.maximum(jnp.dot(c.astype(jnp.bfloat16), w_ref[...],
                                        preferred_element_type=jnp.float32) + b_ref[...], 0.0)

        # ---- all head hidden->logits matmuls AND the value head in one wide MXU op -----------
        hc = jnp.concatenate([h, c], axis=-1).astype(jnp.bfloat16)
        base = jnp.dot(hc, whv_ref[...], preferred_element_type=jnp.float32) + bhv_ref[...]
        value = base[:, sum_heads:sum_heads + 1]          # (TB, 1)

        # ---- autoregressive action heads ------------------------------------------------------
        one_hot_cat = None
        logp_sum = jnp.zeros((tb, 1), jnp.float32)
        ent_cols, action_cols = [], []
        offset = 0
        for i, hs in enumerate(head_sizes):
            logits = base[:, offset:offset + hs]
            if i > 0:
                # normalized previous one-hots @ dependency weight block (tiny matmul)
                norm = jnp.clip(one_hot_cat * INV_STD, -5.0, 5.0)
                logits = logits + jnp.dot(norm.astype(jnp.bfloat16), dep_refs[i - 1][...],
                                          preferred_element_type=jnp.float32)

            col_ids = jax.lax.broadcasted_iota(jnp.int32, (tb, hs), 1)
            mask_b = masks[:, offset:offset + hs] > 0
            has_action = jnp.any(mask_b, axis=-1, keepdims=True)
            # rows with no allowed action force-enable action 0
            mask_b = mask_b | (jnp.logical_not(has_action) & (col_ids == 0))
            masked_logits = jnp.where(mask_b, logits, -1e30)

            m = jnp.max(masked_logits, axis=-1, keepdims=True)
            # deterministic action = argmax (first occurrence); softmax is monotone so
            # argmax(probs) == argmax(masked_logits) -> reuse m, skip a second XLU reduction.
            action = jnp.min(jnp.where(masked_logits >= m, col_ids, hs),
                             axis=-1, keepdims=True)                       # (TB, 1) int32

            e = jnp.exp(masked_logits - m)
            denom = jnp.sum(e, axis=-1, keepdims=True)
            probs = e * pl.reciprocal(denom, approx=True)                  # EUP slot

            one_hot = (col_ids == action).astype(jnp.float32)
            log_pmf = jnp.log(jnp.clip(probs, F32_EPS, 1.0 - F32_EPS))
            logp_sum = logp_sum + jnp.sum(one_hot * log_pmf, axis=-1, keepdims=True)
            ent_cols.append(-jnp.sum(probs * log_pmf, axis=-1, keepdims=True))
            action_cols.append(action)

            one_hot_cat = one_hot if one_hot_cat is None else jnp.concatenate(
                [one_hot_cat, one_hot], axis=-1)
            offset += hs

        # ---- single lane-dense packed output (one unmasked 128-wide store) --------------------
        ent_cat = jnp.concatenate(ent_cols, axis=-1)
        actions_f = jnp.concatenate(action_cols, axis=-1).astype(jnp.float32)
        pad = 128 - (2 + 2 * n_heads)
        out_ref[...] = jnp.concatenate(
            [logp_sum, ent_cat, value, actions_f,
             jnp.zeros((tb, pad), jnp.float32)], axis=-1)

    return kernel


def policy_forward(x, action_masks, actor_params, head_params, critic_params,
                   critic_head, head_sizes, actor_in_size, critic_in_size,
                   block_b=256):
    B, S, OBS = x.shape
    n_heads = len(head_sizes)
    sum_heads = sum(head_sizes)
    assert 2 + 2 * n_heads <= 128
    assert len(actor_params) >= 1 and len(critic_params) >= 1

    bf = jnp.bfloat16
    d_x = max(actor_in_size, critic_in_size)
    x_in = x.reshape(B, S * OBS)[:, :d_x].astype(bf)
    masks_i32 = action_masks.astype(jnp.int32)

    fuse_first = (actor_in_size == critic_in_size)
    a_w0, a_b0 = actor_params[0]
    c_w0, c_b0 = critic_params[0]
    actor_h1, critic_h1 = a_w0.shape[1], c_w0.shape[1]

    flat = []
    if fuse_first:
        flat += [jnp.concatenate([a_w0, c_w0], axis=1).astype(bf),
                 jnp.concatenate([a_b0, c_b0], axis=1).astype(jnp.float32)]
    else:
        flat += [a_w0.astype(bf), a_b0.astype(jnp.float32),
                 c_w0.astype(bf), c_b0.astype(jnp.float32)]

    # remaining hidden layers: fuse actor/critic depth-wise with block-diagonal weights
    trunk_plan = []
    na, nc = len(actor_params) - 1, len(critic_params) - 1
    h_dim, c_dim = actor_h1, critic_h1
    for d in range(max(na, nc)):
        if d < na and d < nc:
            wa, ba = actor_params[1 + d]
            wc, bc = critic_params[1 + d]
            a_in, a_out = wa.shape
            c_in, c_out = wc.shape
            w = jnp.zeros((a_in + c_in, a_out + c_out), jnp.float32)
            w = w.at[:a_in, :a_out].set(wa)
            w = w.at[a_in:, a_out:].set(wc)
            b = jnp.concatenate([ba, bc], axis=1)
            trunk_plan.append(("both", a_out, c_out))
            flat += [w.astype(bf), b.astype(jnp.float32)]
            h_dim, c_dim = a_out, c_out
        elif d < na:
            wa, ba = actor_params[1 + d]
            trunk_plan.append(("actor",))
            flat += [wa.astype(bf), ba.astype(jnp.float32)]
            h_dim = wa.shape[1]
        else:
            wc, bc = critic_params[1 + d]
            trunk_plan.append(("critic",))
            flat += [wc.astype(bf), bc.astype(jnp.float32)]
            c_dim = wc.shape[1]

    hidden_size = h_dim
    # fused (actor hidden -> all head logits) + (critic hidden -> value) weight
    w_heads = jnp.concatenate([w[:hidden_size, :] for w, _ in head_params], axis=1)
    b_heads = jnp.concatenate([b for _, b in head_params], axis=1)
    w_ch, b_ch = critic_head
    v_cols = w_ch.shape[1]
    w_hv = jnp.zeros((hidden_size + c_dim, sum_heads + v_cols), jnp.float32)
    w_hv = w_hv.at[:hidden_size, :sum_heads].set(w_heads)
    w_hv = w_hv.at[hidden_size:, sum_heads:].set(w_ch)
    b_hv = jnp.concatenate([b_heads, b_ch], axis=1)
    flat += [w_hv.astype(bf), b_hv.astype(jnp.float32)]

    # per-head autoregressive (one-hot) weight blocks
    for i, (w, _) in enumerate(head_params):
        if i > 0:
            flat.append(w[hidden_size:, :].astype(bf))

    # batch tile: multiple of 16 (bf16 sublane tiling); weights are VMEM-resident across tiles
    tb = max(16, min(int(block_b), B))
    tb = ((tb + 15) // 16) * 16
    grid = (pl.cdiv(B, tb),)

    in_specs = [pl.BlockSpec((tb, d_x), lambda i: (i, 0)),
                pl.BlockSpec((tb, sum_heads), lambda i: (i, 0))]
    in_specs += [pl.BlockSpec(p.shape, lambda i: (0, 0)) for p in flat]
    out_shape = jax.ShapeDtypeStruct((B, 128), jnp.float32)
    out_specs = pl.BlockSpec((tb, 128), lambda i: (i, 0))

    kernel = make_policy_kernel(tuple(trunk_plan), tuple(head_sizes), fuse_first,
                                actor_h1, critic_h1, actor_in_size, critic_in_size)

    out_f = pl.pallas_call(
        kernel,
        out_shape=out_shape,
        grid=grid,
        in_specs=in_specs,
        out_specs=out_specs,
        compiler_params=pltpu.CompilerParams(
            dimension_semantics=("parallel",)),   # batch tiles shard across TCs
    )(x_in, masks_i32, *flat)

    log_probs = out_f[:, 0]
    entropy = out_f[:, 1:1 + n_heads]
    values = out_f[:, 1 + n_heads]
    actions = out_f[:, 2 + n_heads:2 + 2 * n_heads].astype(jnp.int32)
    return actions, log_probs, entropy, values


def reference_forward(x, action_masks, actor_params, head_params, critic_params,
                      critic_head, head_sizes, actor_in_size, critic_in_size):
    # Same math as the PyTorch module, with matmul operands in bf16 (matching the kernel's
    # declared precision policy) and f32 accumulation / elementwise math.
    bf = jnp.bfloat16
    B = x.shape[0]
    xf = x.reshape(B, -1).astype(jnp.float32)

    def lin(a, w, b):
        return jnp.dot(a.astype(bf), w.astype(bf),
                       preferred_element_type=jnp.float32) + b.astype(jnp.float32)

    h = xf[:, :actor_in_size]
    for w, b in actor_params:
        h = jnp.maximum(lin(h, w, b), 0.0)

    one_hot_cat = None
    actions, logps, ents = [], [], []
    off = 0
    for i, hs in enumerate(head_sizes):
        cur = h
        if i > 0:
            norm = jnp.clip(one_hot_cat * INV_STD, -5.0, 5.0)
            cur = jnp.concatenate([cur, norm], axis=-1)
        w, b = head_params[i]
        logits = lin(cur, w, b)
        mb = action_masks[:, off:off + hs]
        has = jnp.any(mb, axis=-1, keepdims=True)
        ids = jnp.arange(hs)[None, :]
        mb = mb | (~has & (ids == 0))
        ml = jnp.where(mb, logits, -1e30)
        probs = jax.nn.softmax(ml, axis=-1)
        act = jnp.argmax(ml, axis=-1)
        oh = jax.nn.one_hot(act, hs, dtype=jnp.float32)
        cl = jnp.clip(probs, F32_EPS, 1.0 - F32_EPS)
        logps.append(jnp.sum(oh * jnp.log(cl), axis=-1))
        ents.append(-jnp.sum(probs * jnp.log(cl), axis=-1))
        actions.append(act.astype(jnp.int32))
        one_hot_cat = oh if one_hot_cat is None else jnp.concatenate([one_hot_cat, oh], -1)
        off += hs

    c = xf[:, :critic_in_size]
    for w, b in critic_params:
        c = jnp.maximum(lin(c, w, b), 0.0)
    w, b = critic_head
    val = lin(c, w, b)[:, 0]
    return (jnp.stack(actions, 1), jnp.stack(logps, 1).sum(1), jnp.stack(ents, 1), val)


if __name__ == "__main__":
    key = jax.random.PRNGKey(0)
    B, S, OBS = 32, 2, 16
    head_sizes = [5, 3, 4]
    actor_layers = [128, 128, 128]     # actor_config default
    critic_layers = [64, 64]           # critic_config default
    actor_in = critic_in = S * OBS     # identity feature extractor (default MlpConfig)

    keys = iter(jax.random.split(key, 64))

    def linear_init(fan_in, fan_out, gain):
        w = jax.random.normal(next(keys), (fan_in, fan_out), jnp.float32) * (gain / (fan_in ** 0.5))
        b = jax.random.normal(next(keys), (1, fan_out), jnp.float32) * 0.01
        return w, b

    actor_params = []
    last = actor_in
    for hsz in actor_layers:
        actor_params.append(linear_init(last, hsz, 2.0 ** 0.5))
        last = hsz
    actor_hidden_size = last

    head_params = []
    prefix = 0
    for hs in head_sizes:
        head_params.append(linear_init(actor_hidden_size + prefix, hs, 0.01))
        prefix += hs

    critic_params = []
    last = critic_in
    for hsz in critic_layers:
        critic_params.append(linear_init(last, hsz, 2.0 ** 0.5))
        last = hsz
    critic_head = linear_init(last, 1, 1.0)

    x = jax.random.normal(next(keys), (B, S, OBS), jnp.float32)
    masks = jax.random.uniform(next(keys), (B, sum(head_sizes))) < 0.7
    masks = masks.at[0, 5:8].set(False)   # exercise the "no allowed action" branch on head 1

    # block_b=16 -> grid=(2,) here, exercising the batch pipeline; defaults to 256 at scale.
    actions, log_probs, entropy, values = policy_forward(
        x, masks, actor_params, head_params, critic_params, critic_head,
        head_sizes, actor_in, critic_in, block_b=16)
    jax.block_until_ready((actions, log_probs, entropy, values))

    ref_actions, ref_logp, ref_ent, ref_val = reference_forward(
        x, masks, actor_params, head_params, critic_params, critic_head,
        head_sizes, actor_in, critic_in)

    assert actions.shape == (B, len(head_sizes)) and log_probs.shape == (B,)
    assert entropy.shape == (B, len(head_sizes)) and values.shape == (B,)
    assert bool(jnp.all(actions == ref_actions))
    # 2e-3 tolerance covers the approx softmax reciprocal (~1e-4 rel) and matmul-fusion reassociation
    assert bool(jnp.allclose(log_probs, ref_logp, atol=2e-3, rtol=2e-3))
    assert bool(jnp.allclose(entropy, ref_ent, atol=2e-3, rtol=2e-3))
    assert bool(jnp.allclose(values, ref_val, atol=2e-3, rtol=2e-3))

    print("KERNEL_OK")
</pallas_src>

<mosaic_0001>
module attributes {stable_mosaic.version = 11 : i64} {
  func.func @kernel(%arg0: i32, %arg1: memref<16x32xbf16, #tpu.memory_space<vmem>>, %arg2: memref<16x12xi32, #tpu.memory_space<vmem>>, %arg3: memref<32x192xbf16, #tpu.memory_space<vmem>>, %arg4: memref<1x192xf32, #tpu.memory_space<vmem>>, %arg5: memref<192x192xbf16, #tpu.memory_space<vmem>>, %arg6: memref<1x192xf32, #tpu.memory_space<vmem>>, %arg7: memref<128x128xbf16, #tpu.memory_space<vmem>>, %arg8: memref<1x128xf32, #tpu.memory_space<vmem>>, %arg9: memref<192x13xbf16, #tpu.memory_space<vmem>>, %arg10: memref<1x13xf32, #tpu.memory_space<vmem>>, %arg11: memref<5x3xbf16, #tpu.memory_space<vmem>>, %arg12: memref<8x4xbf16, #tpu.memory_space<vmem>>, %arg13: memref<16x128xf32, #tpu.memory_space<vmem>>) attributes {dimension_semantics = [#tpu.dimension_semantics<parallel>], iteration_bounds = array<i64: 2>, scalar_prefetch = 0 : i64, scratch_operands = 0 : i64, tpu.core_type = #tpu.core_type<tc>, window_params = [{transform_indices = @transform_0, window_bounds = array<i64: 16, 32>}, {transform_indices = @transform_1, window_bounds = array<i64: 16, 12>}, {pipeline_mode = #tpu.pipeline_mode<synchronous>, transform_indices = @transform_2, window_bounds = array<i64: 32, 192>}, {pipeline_mode = #tpu.pipeline_mode<synchronous>, transform_indices = @transform_3, window_bounds = array<i64: 1, 192>}, {pipeline_mode = #tpu.pipeline_mode<synchronous>, transform_indices = @transform_4, window_bounds = array<i64: 192, 192>}, {pipeline_mode = #tpu.pipeline_mode<synchronous>, transform_indices = @transform_5, window_bounds = array<i64: 1, 192>}, {pipeline_mode = #tpu.pipeline_mode<synchronous>, transform_indices = @transform_6, window_bounds = array<i64: 128, 128>}, {pipeline_mode = #tpu.pipeline_mode<synchronous>, transform_indices = @transform_7, window_bounds = array<i64: 1, 128>}, {pipeline_mode = #tpu.pipeline_mode<synchronous>, transform_indices = @transform_8, window_bounds = array<i64: 192, 13>}, {pipeline_mode = #tpu.pipeline_mode<synchronous>, transform_indices = @transform_9, window_bounds = array<i64: 1, 13>}, {pipeline_mode = #tpu.pipeline_mode<synchronous>, transform_indices = @transform_10, window_bounds = array<i64: 5, 3>}, {pipeline_mode = #tpu.pipeline_mode<synchronous>, transform_indices = @transform_11, window_bounds = array<i64: 8, 4>}, {transform_indices = @transform_12, window_bounds = array<i64: 16, 128>}]} {
    %c0 = arith.constant 0 : index
    %c0_0 = arith.constant 0 : index
    %0 = vector.load %arg1[%c0, %c0_0] : memref<16x32xbf16, #tpu.memory_space<vmem>>, vector<16x32xbf16>
    %c0_1 = arith.constant 0 : index
    %c0_2 = arith.constant 0 : index
    %1 = vector.load %arg2[%c0_1, %c0_2] : memref<16x12xi32, #tpu.memory_space<vmem>>, vector<16x12xi32>
    %c0_3 = arith.constant 0 : index
    %c0_4 = arith.constant 0 : index
    %2 = vector.load %arg3[%c0_3, %c0_4] : memref<32x192xbf16, #tpu.memory_space<vmem>>, vector<32x192xbf16>
    %cst = arith.constant dense<0.000000e+00> : vector<16x192xf32>
    %3 = tpu.matmul %0, %2, %cst {dimension_numbers = #tpu.dot_dimension_numbers<[1], [0], [0], [1], [0, 0, 1, 1], [], []>} : vector<16x32xbf16>, vector<32x192xbf16>, vector<16x192xf32> -> vector<16x192xf32>
    %c0_5 = arith.constant 0 : index
    %c0_6 = arith.constant 0 : index
    %4 = vector.load %arg4[%c0_5, %c0_6] : memref<1x192xf32, #tpu.memory_space<vmem>>, vector<1x192xf32>
    %5 = vector.broadcast %4 : vector<1x192xf32> to vector<16x192xf32>
    %6 = arith.addf %3, %5 : vector<16x192xf32>
    %7 = vector.extract_strided_slice %6 {offsets = [0, 0], sizes = [16, 128], strides = [1, 1]} : vector<16x192xf32> to vector<16x128xf32>
    %cst_7 = arith.constant 0.000000e+00 : f32
    %8 = vector.broadcast %cst_7 : f32 to vector<16x128xf32>
    %9 = arith.maximumf %7, %8 : vector<16x128xf32>
    %10 = vector.extract_strided_slice %6 {offsets = [0, 128], sizes = [16, 64], strides = [1, 1]} : vector<16x192xf32> to vector<16x64xf32>
    %cst_8 = arith.constant 0.000000e+00 : f32
    %11 = vector.broadcast %cst_8 : f32 to vector<16x64xf32>
    %12 = arith.maximumf %10, %11 : vector<16x64xf32>
    %13 = tpu.concatenate %9, %12 in 1 : vector<16x128xf32>, vector<16x64xf32> -> vector<16x192xf32>
    %14 = arith.truncf %13 : vector<16x192xf32> to vector<16x192xbf16>
    %c0_9 = arith.constant 0 : index
    %c0_10 = arith.constant 0 : index
    %15 = vector.load %arg5[%c0_9, %c0_10] : memref<192x192xbf16, #tpu.memory_space<vmem>>, vector<192x192xbf16>
    %cst_11 = arith.constant dense<0.000000e+00> : vector<16x192xf32>
    %16 = tpu.matmul %14, %15, %cst_11 {dimension_numbers = #tpu.dot_dimension_numbers<[1], [0], [0], [1], [0, 0, 1, 1], [], []>} : vector<16x192xbf16>, vector<192x192xbf16>, vector<16x192xf32> -> vector<16x192xf32>
    %c0_12 = arith.constant 0 : index
    %c0_13 = arith.constant 0 : index
    %17 = vector.load %arg6[%c0_12, %c0_13] : memref<1x192xf32, #tpu.memory_space<vmem>>, vector<1x192xf32>
    %18 = vector.broadcast %17 : vector<1x192xf32> to vector<16x192xf32>
    %19 = arith.addf %16, %18 : vector<16x192xf32>
    %cst_14 = arith.constant 0.000000e+00 : f32
    %20 = vector.broadcast %cst_14 : f32 to vector<16x192xf32>
    %21 = arith.maximumf %19, %20 : vector<16x192xf32>
    %22 = vector.extract_strided_slice %21 {offsets = [0, 0], sizes = [16, 128], strides = [1, 1]} : vector<16x192xf32> to vector<16x128xf32>
    %23 = vector.extract_strided_slice %21 {offsets = [0, 128], sizes = [16, 64], strides = [1, 1]} : vector<16x192xf32> to vector<16x64xf32>
    %24 = arith.truncf %22 : vector<16x128xf32> to vector<16x128xbf16>
    %c0_15 = arith.constant 0 : index
    %c0_16 = arith.constant 0 : index
    %25 = vector.load %arg7[%c0_15, %c0_16] : memref<128x128xbf16, #tpu.memory_space<vmem>>, vector<128x128xbf16>
    %cst_17 = arith.constant dense<0.000000e+00> : vector<16x128xf32>
    %26 = tpu.matmul %24, %25, %cst_17 {dimension_numbers = #tpu.dot_dimension_numbers<[1], [0], [0], [1], [0, 0, 1, 1], [], []>} : vector<16x128xbf16>, vector<128x128xbf16>, vector<16x128xf32> -> vector<16x128xf32>
    %c0_18 = arith.constant 0 : index
    %c0_19 = arith.constant 0 : index
    %27 = vector.load %arg8[%c0_18, %c0_19] : memref<1x128xf32, #tpu.memory_space<vmem>>, vector<1x128xf32>
    %28 = vector.broadcast %27 : vector<1x128xf32> to vector<16x128xf32>
    %29 = arith.addf %26, %28 : vector<16x128xf32>
    %cst_20 = arith.constant 0.000000e+00 : f32
    %30 = vector.broadcast %cst_20 : f32 to vector<16x128xf32>
    %31 = arith.maximumf %29, %30 : vector<16x128xf32>
    %32 = tpu.concatenate %31, %23 in 1 : vector<16x128xf32>, vector<16x64xf32> -> vector<16x192xf32>
    %33 = arith.truncf %32 : vector<16x192xf32> to vector<16x192xbf16>
    %c0_21 = arith.constant 0 : index
    %c0_22 = arith.constant 0 : index
    %34 = vector.load %arg9[%c0_21, %c0_22] : memref<192x13xbf16, #tpu.memory_space<vmem>>, vector<192x13xbf16>
    %cst_23 = arith.constant dense<0.000000e+00> : vector<16x13xf32>
    %35 = tpu.matmul %33, %34, %cst_23 {dimension_numbers = #tpu.dot_dimension_numbers<[1], [0], [0], [1], [0, 0, 1, 1], [], []>} : vector<16x192xbf16>, vector<192x13xbf16>, vector<16x13xf32> -> vector<16x13xf32>
    %c0_24 = arith.constant 0 : index
    %c0_25 = arith.constant 0 : index
    %36 = vector.load %arg10[%c0_24, %c0_25] : memref<1x13xf32, #tpu.memory_space<vmem>>, vector<1x13xf32>
    %37 = vector.broadcast %36 : vector<1x13xf32> to vector<16x13xf32>
    %38 = arith.addf %35, %37 : vector<16x13xf32>
    %39 = vector.extract_strided_slice %38 {offsets = [0, 12], sizes = [16, 1], strides = [1, 1]} : vector<16x13xf32> to vector<16x1xf32>
    %cst_26 = arith.constant 0.000000e+00 : f32
    %40 = vector.broadcast %cst_26 : f32 to vector<16x1xf32>
    %41 = vector.extract_strided_slice %38 {offsets = [0, 0], sizes = [16, 5], strides = [1, 1]} : vector<16x13xf32> to vector<16x5xf32>
    %42 = tpu.iota {dimensions = array<i32: 1>} : vector<16x5xi32>
    %43 = vector.extract_strided_slice %1 {offsets = [0, 0], sizes = [16, 5], strides = [1, 1]} : vector<16x12xi32> to vector<16x5xi32>
    %c0_i32 = arith.constant 0 : i32
    %44 = vector.broadcast %c0_i32 : i32 to vector<16x5xi32>
    %45 = arith.cmpi sgt, %43, %44 : vector<16x5xi32>
    %cst_27 = arith.constant 1.000000e+00 : f32
    %cst_28 = arith.constant 0.000000e+00 : f32
    %46 = vector.broadcast %cst_27 : f32 to vector<16x5xf32>
    %47 = vector.broadcast %cst_28 : f32 to vector<16x5xf32>
    %48 = arith.select %45, %46, %47 : vector<16x5xi1>, vector<16x5xf32>
    %cst_29 = arith.constant dense<0xFF800000> : vector<16xf32>
    %49 = vector.multi_reduction <maximumf>, %48, %cst_29 [1] : vector<16x5xf32> to vector<16xf32>
    %cst_30 = arith.constant 0.000000e+00 : f32
    %50 = vector.broadcast %cst_30 : f32 to vector<16xf32>
    %51 = arith.cmpf ogt, %49, %50 : vector<16xf32>
    %52 = vector.shape_cast %51 : vector<16xi1> to vector<16x1xi1>
    %cst_31 = arith.constant dense<true> : vector<16x1xi1>
    %53 = arith.xori %52, %cst_31 : vector<16x1xi1>
    %c0_i32_32 = arith.constant 0 : i32
    %54 = vector.broadcast %c0_i32_32 : i32 to vector<16x5xi32>
    %55 = arith.cmpi eq, %42, %54 : vector<16x5xi32>
    %56 = vector.broadcast %53 : vector<16x1xi1> to vector<16x5xi1>
    %57 = arith.andi %56, %55 : vector<16x5xi1>
    %58 = arith.ori %45, %57 : vector<16x5xi1>
    %cst_33 = arith.constant -1.000000e+30 : f32
    %59 = vector.broadcast %cst_33 : f32 to vector<16x5xf32>
    %60 = arith.select %58, %41, %59 : vector<16x5xi1>, vector<16x5xf32>
    %cst_34 = arith.constant dense<0xFF800000> : vector<16xf32>
    %61 = vector.multi_reduction <maximumf>, %60, %cst_34 [1] : vector<16x5xf32> to vector<16xf32>
    %62 = vector.shape_cast %61 : vector<16xf32> to vector<16x1xf32>
    %63 = vector.broadcast %62 : vector<16x1xf32> to vector<16x5xf32>
    %64 = arith.cmpf oge, %60, %63 : vector<16x5xf32>
    %c5_i32 = arith.constant 5 : i32
    %65 = vector.broadcast %c5_i32 : i32 to vector<16x5xi32>
    %66 = arith.select %64, %42, %65 : vector<16x5xi1>, vector<16x5xi32>
    %cst_35 = arith.constant dense<2147483647> : vector<16xi32>
    %67 = vector.multi_reduction <minsi>, %66, %cst_35 [1] : vector<16x5xi32> to vector<16xi32>
    %68 = vector.shape_cast %67 : vector<16xi32> to vector<16x1xi32>
    %69 = vector.broadcast %62 : vector<16x1xf32> to vector<16x5xf32>
    %70 = arith.subf %60, %69 : vector<16x5xf32>
    %71 = math.exp %70 : vector<16x5xf32>
    %cst_36 = arith.constant dense<0.000000e+00> : vector<16xf32>
    %72 = vector.multi_reduction <add>, %71, %cst_36 [1] : vector<16x5xf32> to vector<16xf32>
    %73 = vector.shape_cast %72 : vector<16xf32> to vector<16x1xf32>
    %74 = tpu.reciprocal %73 {approx = true} : vector<16x1xf32> -> vector<16x1xf32>
    %75 = vector.broadcast %74 : vector<16x1xf32> to vector<16x5xf32>
    %76 = arith.mulf %71, %75 : vector<16x5xf32>
    %77 = vector.broadcast %68 : vector<16x1xi32> to vector<16x5xi32>
    %78 = arith.cmpi eq, %42, %77 : vector<16x5xi32>
    %79 = arith.extui %78 : vector<16x5xi1> to vector<16x5xi32>
    %80 = arith.sitofp %79 : vector<16x5xi32> to vector<16x5xf32>
    %cst_37 = arith.constant 1.1920929E-7 : f32
    %cst_38 = arith.constant 0.99999988 : f32
    %81 = vector.broadcast %cst_37 : f32 to vector<16x5xf32>
    %82 = arith.maximumf %81, %76 : vector<16x5xf32>
    %83 = vector.broadcast %cst_38 : f32 to vector<16x5xf32>
    %84 = arith.minimumf %83, %82 : vector<16x5xf32>
    %85 = math.log %84 : vector<16x5xf32>
    %86 = arith.mulf %80, %85 : vector<16x5xf32>
    %cst_39 = arith.constant dense<0.000000e+00> : vector<16xf32>
    %87 = vector.multi_reduction <add>, %86, %cst_39 [1] : vector<16x5xf32> to vector<16xf32>
    %88 = vector.shape_cast %87 : vector<16xf32> to vector<16x1xf32>
    %89 = arith.addf %40, %88 : vector<16x1xf32>
    %90 = arith.mulf %76, %85 : vector<16x5xf32>
    %cst_40 = arith.constant dense<0.000000e+00> : vector<16xf32>
    %91 = vector.multi_reduction <add>, %90, %cst_40 [1] : vector<16x5xf32> to vector<16xf32>
    %92 = vector.shape_cast %91 : vector<16xf32> to vector<16x1xf32>
    %cst_41 = arith.constant 0.000000e+00 : f32
    %93 = vector.broadcast %cst_41 : f32 to vector<16x1xf32>
    %94 = arith.subf %93, %92 : vector<16x1xf32>
    %95 = vector.extract_strided_slice %38 {offsets = [0, 5], sizes = [16, 3], strides = [1, 1]} : vector<16x13xf32> to vector<16x3xf32>
    %cst_42 = arith.constant 1.000000e+00 : f32
    %96 = vector.broadcast %cst_42 : f32 to vector<16x5xf32>
    %97 = arith.mulf %80, %96 : vector<16x5xf32>
    %cst_43 = arith.constant -5.000000e+00 : f32
    %cst_44 = arith.constant 5.000000e+00 : f32
    %98 = vector.broadcast %cst_43 : f32 to vector<16x5xf32>
    %99 = arith.maximumf %98, %97 : vector<16x5xf32>
    %100 = vector.broadcast %cst_44 : f32 to vector<16x5xf32>
    %101 = arith.minimumf %100, %99 : vector<16x5xf32>
    %102 = arith.truncf %101 : vector<16x5xf32> to vector<16x5xbf16>
    %c0_45 = arith.constant 0 : index
    %c0_46 = arith.constant 0 : index
    %103 = vector.load %arg11[%c0_45, %c0_46] : memref<5x3xbf16, #tpu.memory_space<vmem>>, vector<5x3xbf16>
    %cst_47 = arith.constant dense<0.000000e+00> : vector<16x3xf32>
    %104 = tpu.matmul %102, %103, %cst_47 {dimension_numbers = #tpu.dot_dimension_numbers<[1], [0], [0], [1], [0, 0, 1, 1], [], []>} : vector<16x5xbf16>, vector<5x3xbf16>, vector<16x3xf32> -> vector<16x3xf32>
    %105 = arith.addf %95, %104 : vector<16x3xf32>
    %106 = tpu.iota {dimensions = array<i32: 1>} : vector<16x3xi32>
    %107 = vector.extract_strided_slice %1 {offsets = [0, 5], sizes = [16, 3], strides = [1, 1]} : vector<16x12xi32> to vector<16x3xi32>
    %c0_i32_48 = arith.constant 0 : i32
    %108 = vector.broadcast %c0_i32_48 : i32 to vector<16x3xi32>
    %109 = arith.cmpi sgt, %107, %108 : vector<16x3xi32>
    %cst_49 = arith.constant 1.000000e+00 : f32
    %cst_50 = arith.constant 0.000000e+00 : f32
    %110 = vector.broadcast %cst_49 : f32 to vector<16x3xf32>
    %111 = vector.broadcast %cst_50 : f32 to vector<16x3xf32>
    %112 = arith.select %109, %110, %111 : vector<16x3xi1>, vector<16x3xf32>
    %cst_51 = arith.constant dense<0xFF800000> : vector<16xf32>
    %113 = vector.multi_reduction <maximumf>, %112, %cst_51 [1] : vector<16x3xf32> to vector<16xf32>
    %cst_52 = arith.constant 0.000000e+00 : f32
    %114 = vector.broadcast %cst_52 : f32 to vector<16xf32>
    %115 = arith.cmpf ogt, %113, %114 : vector<16xf32>
    %116 = vector.shape_cast %115 : vector<16xi1> to vector<16x1xi1>
    %cst_53 = arith.constant dense<true> : vector<16x1xi1>
    %117 = arith.xori %116, %cst_53 : vector<16x1xi1>
    %c0_i32_54 = arith.constant 0 : i32
    %118 = vector.broadcast %c0_i32_54 : i32 to vector<16x3xi32>
    %119 = arith.cmpi eq, %106, %118 : vector<16x3xi32>
    %120 = vector.broadcast %117 : vector<16x1xi1> to vector<16x3xi1>
    %121 = arith.andi %120, %119 : vector<16x3xi1>
    %122 = arith.ori %109, %121 : vector<16x3xi1>
    %cst_55 = arith.constant -1.000000e+30 : f32
    %123 = vector.broadcast %cst_55 : f32 to vector<16x3xf32>
    %124 = arith.select %122, %105, %123 : vector<16x3xi1>, vector<16x3xf32>
    %cst_56 = arith.constant dense<0xFF800000> : vector<16xf32>
    %125 = vector.multi_reduction <maximumf>, %124, %cst_56 [1] : vector<16x3xf32> to vector<16xf32>
    %126 = vector.shape_cast %125 : vector<16xf32> to vector<16x1xf32>
    %127 = vector.broadcast %126 : vector<16x1xf32> to vector<16x3xf32>
    %128 = arith.cmpf oge, %124, %127 : vector<16x3xf32>
    %c3_i32 = arith.constant 3 : i32
    %129 = vector.broadcast %c3_i32 : i32 to vector<16x3xi32>
    %130 = arith.select %128, %106, %129 : vector<16x3xi1>, vector<16x3xi32>
    %cst_57 = arith.constant dense<2147483647> : vector<16xi32>
    %131 = vector.multi_reduction <minsi>, %130, %cst_57 [1] : vector<16x3xi32> to vector<16xi32>
    %132 = vector.shape_cast %131 : vector<16xi32> to vector<16x1xi32>
    %133 = vector.broadcast %126 : vector<16x1xf32> to vector<16x3xf32>
    %134 = arith.subf %124, %133 : vector<16x3xf32>
    %135 = math.exp %134 : vector<16x3xf32>
    %cst_58 = arith.constant dense<0.000000e+00> : vector<16xf32>
    %136 = vector.multi_reduction <add>, %135, %cst_58 [1] : vector<16x3xf32> to vector<16xf32>
    %137 = vector.shape_cast %136 : vector<16xf32> to vector<16x1xf32>
    %138 = tpu.reciprocal %137 {approx = true} : vector<16x1xf32> -> vector<16x1xf32>
    %139 = vector.broadcast %138 : vector<16x1xf32> to vector<16x3xf32>
    %140 = arith.mulf %135, %139 : vector<16x3xf32>
    %141 = vector.broadcast %132 : vector<16x1xi32> to vector<16x3xi32>
    %142 = arith.cmpi eq, %106, %141 : vector<16x3xi32>
    %143 = arith.extui %142 : vector<16x3xi1> to vector<16x3xi32>
    %144 = arith.sitofp %143 : vector<16x3xi32> to vector<16x3xf32>
    %cst_59 = arith.constant 1.1920929E-7 : f32
    %cst_60 = arith.constant 0.99999988 : f32
    %145 = vector.broadcast %cst_59 : f32 to vector<16x3xf32>
    %146 = arith.maximumf %145, %140 : vector<16x3xf32>
    %147 = vector.broadcast %cst_60 : f32 to vector<16x3xf32>
    %148 = arith.minimumf %147, %146 : vector<16x3xf32>
    %149 = math.log %148 : vector<16x3xf32>
    %150 = arith.mulf %144, %149 : vector<16x3xf32>
    %cst_61 = arith.constant dense<0.000000e+00> : vector<16xf32>
    %151 = vector.multi_reduction <add>, %150, %cst_61 [1] : vector<16x3xf32> to vector<16xf32>
    %152 = vector.shape_cast %151 : vector<16xf32> to vector<16x1xf32>
    %153 = arith.addf %89, %152 : vector<16x1xf32>
    %154 = arith.mulf %140, %149 : vector<16x3xf32>
    %cst_62 = arith.constant dense<0.000000e+00> : vector<16xf32>
    %155 = vector.multi_reduction <add>, %154, %cst_62 [1] : vector<16x3xf32> to vector<16xf32>
    %156 = vector.shape_cast %155 : vector<16xf32> to vector<16x1xf32>
    %cst_63 = arith.constant 0.000000e+00 : f32
    %157 = vector.broadcast %cst_63 : f32 to vector<16x1xf32>
    %158 = arith.subf %157, %156 : vector<16x1xf32>
    %159 = tpu.concatenate %80, %144 in 1 : vector<16x5xf32>, vector<16x3xf32> -> vector<16x8xf32>
    %160 = vector.extract_strided_slice %38 {offsets = [0, 8], sizes = [16, 4], strides = [1, 1]} : vector<16x13xf32> to vector<16x4xf32>
    %cst_64 = arith.constant 1.000000e+00 : f32
    %161 = vector.broadcast %cst_64 : f32 to vector<16x8xf32>
    %162 = arith.mulf %159, %161 : vector<16x8xf32>
    %cst_65 = arith.constant -5.000000e+00 : f32
    %cst_66 = arith.constant 5.000000e+00 : f32
    %163 = vector.broadcast %cst_65 : f32 to vector<16x8xf32>
    %164 = arith.maximumf %163, %162 : vector<16x8xf32>
    %165 = vector.broadcast %cst_66 : f32 to vector<16x8xf32>
    %166 = arith.minimumf %165, %164 : vector<16x8xf32>
    %167 = arith.truncf %166 : vector<16x8xf32> to vector<16x8xbf16>
    %c0_67 = arith.constant 0 : index
    %c0_68 = arith.constant 0 : index
    %168 = vector.load %arg12[%c0_67, %c0_68] : memref<8x4xbf16, #tpu.memory_space<vmem>>, vector<8x4xbf16>
    %cst_69 = arith.constant dense<0.000000e+00> : vector<16x4xf32>
    %169 = tpu.matmul %167, %168, %cst_69 {dimension_numbers = #tpu.dot_dimension_numbers<[1], [0], [0], [1], [0, 0, 1, 1], [], []>} : vector<16x8xbf16>, vector<8x4xbf16>, vector<16x4xf32> -> vector<16x4xf32>
    %170 = arith.addf %160, %169 : vector<16x4xf32>
    %171 = tpu.iota {dimensions = array<i32: 1>} : vector<16x4xi32>
    %172 = vector.extract_strided_slice %1 {offsets = [0, 8], sizes = [16, 4], strides = [1, 1]} : vector<16x12xi32> to vector<16x4xi32>
    %c0_i32_70 = arith.constant 0 : i32
    %173 = vector.broadcast %c0_i32_70 : i32 to vector<16x4xi32>
    %174 = arith.cmpi sgt, %172, %173 : vector<16x4xi32>
    %cst_71 = arith.constant 1.000000e+00 : f32
    %cst_72 = arith.constant 0.000000e+00 : f32
    %175 = vector.broadcast %cst_71 : f32 to vector<16x4xf32>
    %176 = vector.broadcast %cst_72 : f32 to vector<16x4xf32>
    %177 = arith.select %174, %175, %176 : vector<16x4xi1>, vector<16x4xf32>
    %cst_73 = arith.constant dense<0xFF800000> : vector<16xf32>
    %178 = vector.multi_reduction <maximumf>, %177, %cst_73 [1] : vector<16x4xf32> to vector<16xf32>
    %cst_74 = arith.constant 0.000000e+00 : f32
    %179 = vector.broadcast %cst_74 : f32 to vector<16xf32>
    %180 = arith.cmpf ogt, %178, %179 : vector<16xf32>
    %181 = vector.shape_cast %180 : vector<16xi1> to vector<16x1xi1>
    %cst_75 = arith.constant dense<true> : vector<16x1xi1>
    %182 = arith.xori %181, %cst_75 : vector<16x1xi1>
    %c0_i32_76 = arith.constant 0 : i32
    %183 = vector.broadcast %c0_i32_76 : i32 to vector<16x4xi32>
    %184 = arith.cmpi eq, %171, %183 : vector<16x4xi32>
    %185 = vector.broadcast %182 : vector<16x1xi1> to vector<16x4xi1>
    %186 = arith.andi %185, %184 : vector<16x4xi1>
    %187 = arith.ori %174, %186 : vector<16x4xi1>
    %cst_77 = arith.constant -1.000000e+30 : f32
    %188 = vector.broadcast %cst_77 : f32 to vector<16x4xf32>
    %189 = arith.select %187, %170, %188 : vector<16x4xi1>, vector<16x4xf32>
    %cst_78 = arith.constant dense<0xFF800000> : vector<16xf32>
    %190 = vector.multi_reduction <maximumf>, %189, %cst_78 [1] : vector<16x4xf32> to vector<16xf32>
    %191 = vector.shape_cast %190 : vector<16xf32> to vector<16x1xf32>
    %192 = vector.broadcast %191 : vector<16x1xf32> to vector<16x4xf32>
    %193 = arith.cmpf oge, %189, %192 : vector<16x4xf32>
    %c4_i32 = arith.constant 4 : i32
    %194 = vector.broadcast %c4_i32 : i32 to vector<16x4xi32>
    %195 = arith.select %193, %171, %194 : vector<16x4xi1>, vector<16x4xi32>
    %cst_79 = arith.constant dense<2147483647> : vector<16xi32>
    %196 = vector.multi_reduction <minsi>, %195, %cst_79 [1] : vector<16x4xi32> to vector<16xi32>
    %197 = vector.shape_cast %196 : vector<16xi32> to vector<16x1xi32>
    %198 = vector.broadcast %191 : vector<16x1xf32> to vector<16x4xf32>
    %199 = arith.subf %189, %198 : vector<16x4xf32>
    %200 = math.exp %199 : vector<16x4xf32>
    %cst_80 = arith.constant dense<0.000000e+00> : vector<16xf32>
    %201 = vector.multi_reduction <add>, %200, %cst_80 [1] : vector<16x4xf32> to vector<16xf32>
    %202 = vector.shape_cast %201 : vector<16xf32> to vector<16x1xf32>
    %203 = tpu.reciprocal %202 {approx = true} : vector<16x1xf32> -> vector<16x1xf32>
    %204 = vector.broadcast %203 : vector<16x1xf32> to vector<16x4xf32>
    %205 = arith.mulf %200, %204 : vector<16x4xf32>
    %206 = vector.broadcast %197 : vector<16x1xi32> to vector<16x4xi32>
    %207 = arith.cmpi eq, %171, %206 : vector<16x4xi32>
    %208 = arith.extui %207 : vector<16x4xi1> to vector<16x4xi32>
    %209 = arith.sitofp %208 : vector<16x4xi32> to vector<16x4xf32>
    %cst_81 = arith.constant 1.1920929E-7 : f32
    %cst_82 = arith.constant 0.99999988 : f32
    %210 = vector.broadcast %cst_81 : f32 to vector<16x4xf32>
    %211 = arith.maximumf %210, %205 : vector<16x4xf32>
    %212 = vector.broadcast %cst_82 : f32 to vector<16x4xf32>
    %213 = arith.minimumf %212, %211 : vector<16x4xf32>
    %214 = math.log %213 : vector<16x4xf32>
    %215 = arith.mulf %209, %214 : vector<16x4xf32>
    %cst_83 = arith.constant dense<0.000000e+00> : vector<16xf32>
    %216 = vector.multi_reduction <add>, %215, %cst_83 [1] : vector<16x4xf32> to vector<16xf32>
    %217 = vector.shape_cast %216 : vector<16xf32> to vector<16x1xf32>
    %218 = arith.addf %153, %217 : vector<16x1xf32>
    %219 = arith.mulf %205, %214 : vector<16x4xf32>
    %cst_84 = arith.constant dense<0.000000e+00> : vector<16xf32>
    %220 = vector.multi_reduction <add>, %219, %cst_84 [1] : vector<16x4xf32> to vector<16xf32>
    %221 = vector.shape_cast %220 : vector<16xf32> to vector<16x1xf32>
    %cst_85 = arith.constant 0.000000e+00 : f32
    %222 = vector.broadcast %cst_85 : f32 to vector<16x1xf32>
    %223 = arith.subf %222, %221 : vector<16x1xf32>
    %224 = tpu.concatenate %94, %158, %223 in 1 : vector<16x1xf32>, vector<16x1xf32>, vector<16x1xf32> -> vector<16x3xf32>
    %225 = tpu.concatenate %68, %132, %197 in 1 : vector<16x1xi32>, vector<16x1xi32>, vector<16x1xi32> -> vector<16x3xi32>
    %226 = arith.sitofp %225 : vector<16x3xi32> to vector<16x3xf32>
    %cst_86 = arith.constant 0.000000e+00 : f32
    %227 = vector.broadcast %cst_86 : f32 to vector<16x120xf32>
    %228 = tpu.concatenate %218, %224, %39, %226, %227 in 1 : vector<16x1xf32>, vector<16x3xf32>, vector<16x1xf32>, vector<16x3xf32>, vector<16x120xf32> -> vector<16x128xf32>
    %c0_87 = arith.constant 0 : index
    %c0_88 = arith.constant 0 : index
    %229 = vector.load %arg13[%c0_87, %c0_88] : memref<16x128xf32, #tpu.memory_space<vmem>>, vector<16x128xf32>
    tpu.vector_store %arg13[%c0_87, %c0_88], %228 {strides = array<i32>} : memref<16x128xf32, #tpu.memory_space<vmem>>, vector<16x128xf32>,
    return
  }
  func.func @transform_0(%arg0: i32) -> (i32, i32) {
    %c0_i32 = arith.constant 0 : i32
    %c0_i32_0 = arith.constant 0 : i32
    return %arg0, %c0_i32 : i32, i32
  }
  func.func @transform_1(%arg0: i32) -> (i32, i32) {
    %c0_i32 = arith.constant 0 : i32
    %c0_i32_0 = arith.constant 0 : i32
    return %arg0, %c0_i32 : i32, i32
  }
  func.func @transform_2(%arg0: i32) -> (i32, i32) {
    %c0_i32 = arith.constant 0 : i32
    %c0_i32_0 = arith.constant 0 : i32
    %c0_i32_1 = arith.constant 0 : i32
    return %c0_i32, %c0_i32_0 : i32, i32
  }
  func.func @transform_3(%arg0: i32) -> (i32, i32) {
    %c0_i32 = arith.constant 0 : i32
    %c0_i32_0 = arith.constant 0 : i32
    %c0_i32_1 = arith.constant 0 : i32
    return %c0_i32, %c0_i32_0 : i32, i32
  }
  func.func @transform_4(%arg0: i32) -> (i32, i32) {
    %c0_i32 = arith.constant 0 : i32
    %c0_i32_0 = arith.constant 0 : i32
    %c0_i32_1 = arith.constant 0 : i32
    return %c0_i32, %c0_i32_0 : i32, i32
  }
  func.func @transform_5(%arg0: i32) -> (i32, i32) {
    %c0_i32 = arith.constant 0 : i32
    %c0_i32_0 = arith.constant 0 : i32
    %c0_i32_1 = arith.constant 0 : i32
    return %c0_i32, %c0_i32_0 : i32, i32
  }
  func.func @transform_6(%arg0: i32) -> (i32, i32) {
    %c0_i32 = arith.constant 0 : i32
    %c0_i32_0 = arith.constant 0 : i32
    %c0_i32_1 = arith.constant 0 : i32
    return %c0_i32, %c0_i32_0 : i32, i32
  }
  func.func @transform_7(%arg0: i32) -> (i32, i32) {
    %c0_i32 = arith.constant 0 : i32
    %c0_i32_0 = arith.constant 0 : i32
    %c0_i32_1 = arith.constant 0 : i32
    return %c0_i32, %c0_i32_0 : i32, i32
  }
  func.func @transform_8(%arg0: i32) -> (i32, i32) {
    %c0_i32 = arith.constant 0 : i32
    %c0_i32_0 = arith.constant 0 : i32
    %c0_i32_1 = arith.constant 0 : i32
    return %c0_i32, %c0_i32_0 : i32, i32
  }
  func.func @transform_9(%arg0: i32) -> (i32, i32) {
    %c0_i32 = arith.constant 0 : i32
    %c0_i32_0 = arith.constant 0 : i32
    %c0_i32_1 = arith.constant 0 : i32
    return %c0_i32, %c0_i32_0 : i32, i32
  }
  func.func @transform_10(%arg0: i32) -> (i32, i32) {
    %c0_i32 = arith.constant 0 : i32
    %c0_i32_0 = arith.constant 0 : i32
    %c0_i32_1 = arith.constant 0 : i32
    return %c0_i32, %c0_i32_0 : i32, i32
  }
  func.func @transform_11(%arg0: i32) -> (i32, i32) {
    %c0_i32 = arith.constant 0 : i32
    %c0_i32_0 = arith.constant 0 : i32
    %c0_i32_1 = arith.constant 0 : i32
    return %c0_i32, %c0_i32_0 : i32, i32
  }
  func.func @transform_12(%arg0: i32) -> (i32, i32) {
    %c0_i32 = arith.constant 0 : i32
    %c0_i32_0 = arith.constant 0 : i32
    return %arg0, %c0_i32 : i32, i32
  }
}

</mosaic_0001>

<bundles_post_ra>
// kernel: tpu_custom_call.1
= control target key start
LH: loop header
LB: loop body
LE: loop exit
PB: predicated region body
PF: predicated region fallthrough
CT: control target
= control target key end

     0   :  { %s2738_s0 = inlined_call_operand.vmem [shape: bf16[32,32], index: 0, kind: input, shape index: {}]   ;;  %s2739_s1 = inlined_call_operand.vmem [shape: s32[32,12], index: 1, kind: input, shape index: {}]   ;;  %s2740_s2 = inlined_call_operand.vmem [shape: bf16[32,192], index: 2, kind: input, shape index: {}]   ;;  %s2741_s3 = inlined_call_operand.vmem [shape: f32[1,192], index: 3, kind: input, shape index: {}]   ;;  %s2742_s4 = inlined_call_operand.hbm [shape: bf16[192,192], index: 4, kind: input, shape index: {}]   ;;  %s2743_s5 = inlined_call_operand.vmem [shape: f32[1,192], index: 5, kind: input, shape index: {}]   ;;  %s2744_s6 = inlined_call_operand.vmem [shape: bf16[128,128], index: 6, kind: input, shape index: {}]   ;;  %s2745_s7 = inlined_call_operand.vmem [shape: f32[1,128], index: 7, kind: input, shape index: {}]   ;;  %s2746_s8 = inlined_call_operand.vmem [shape: bf16[192,13], index: 8, kind: input, shape index: {}]   ;;  %s2747_s9 = inlined_call_operand.vmem [shape: f32[1,13], index: 9, kind: input, shape index: {}]   ;;  %s2748_s10 = inlined_call_operand.vmem [shape: bf16[5,3], index: 10, kind: input, shape index: {}]   ;;  %s2749_s11 = inlined_call_operand.vmem [shape: bf16[8,4], index: 11, kind: input, shape index: {}]   ;;  %s2750_s12 = inlined_call_operand.hbm [shape: f32[32,128], index: 12, kind: output, shape index: {}]  }
   0x1   :  { %2757 = sst [smem:[#allocation11_spill]] %s2742_s4 }
   0x2   :  { %17 = vsyncpa [#allocation3], 0 }
   0x3   :  { %18 = vsyncpa [#allocation4], 0 }
   0x4   :  { %20 = vsyncpa [#allocation4 + $0x1], 0  ;;  %s2191_s21 = smov 0   ;;  %s2193_s22 = smov 0  }
   0x5   :  { %s2195_s23 = smov 0   ;;  %s2197_s24 = smov 0  }
   0x6 LB: > { %2758 = sst [smem:[#allocation8_spill]] %s2105_s23  ;;  %s2212_s25 = sadd.s32 4294967295, %s2109_s24   ;;  %s2109_s24 = sphi %s2197_s24, %s2771_s24   ;;  %s2105_s23 = sphi %s2195_s23, %s2773_s23   ;;  %s2101_s22 = sphi %s2193_s22, %s2775_s22   ;;  %s2097_s21 = sphi %s2191_s21, %s2774_s21  }
   0x7   : > { %s1720_s26 = sadd.s32 4294967294, %s2109_s24   ;;  %s2216_s27 = sadd.s32 1, %s2109_s24  }
   0x8   : > { %2759 = sst [smem:[#allocation9_spill]] %s2216_s27  ;;  %s295_s28 = sadd.s32 1, %s2105_s23 }
   0x9   : > { %s292_s29 = ssub.s32 %s2109_s24, %s2216_s27  ;;  %p305_p0 = scmp.ne.s32.totalorder %s2105_s23, %s2101_s22 }
   0xa   : > { %p293_p1 = scmp.eq.s32.totalorder %s292_s29, 0  ;;  %p306_p2 = scmp.eq.s32.totalorder %s2212_s25, 1 }
   0xb   : > { %p311_p3 = scmp.ne.s32.totalorder %s2101_s22, %s2097_s21  ;;  %p312_p4 = scmp.eq.s32.totalorder %s1720_s26, 1 }
   0xc   : > { %s2227_s30 = scalar_select %p293_p1, %s2105_s23, %s295_s28  }
   0xd   : > { %p2229_p5 = por %p306_p2, %p305_p0  ;;  %p2233_p6 = por %p312_p4, %p311_p3 }
   0xe   : > { %2760 = sst [smem:[#allocation10_spill]] %s2227_s30  ;;  %p1721_p7 = scmp.ge.s32.totalorder %s2109_s24, 1 }
   0xf   : > { %s2761_s13 = scalar_select %p2229_p5, 1, 0 }
  0x10   : > { %s2762_s14 = scalar_select %p2233_p6, 1, 0 }
  0x11   : > { %p319_p8 = scmp.lt.s32.totalorder %s2109_s24, 3  ;;  %p2752_p9 = scmp.eq.s32.totalorder %s2212_s25, 0 }
  0x12   : > { %s2111_s16 = smov [#allocation2]   ;;  %s2765_s4 = sld [smem:[#allocation11_spill]] }
  0x13   : > { %p2240_p10 = pnand %p1721_p7, %p319_p8  ;;  %s337_s17 = sshll.u32 %s2111_s16, 4  ;;  %s338_s17 = int_to_ptr.vmem [resolvable:$true] %s337_s17 }
  0x15   : > { %s2763_s15 = scalar_select %p2240_p10, 1, 0 }
  0x16   : > { %p1854_p11 = pneg %p2240_p10 }
  0x18   : > { %p2248_p12 = pnand %p2752_p9, %p1854_p11  ;;  %s2015_s26 = scalar_lea.hbm %s2765_s4, 3072 }
  0x19   : > { %p2016_p13 = scmp.ne.s32.totalorder %s2765_s4, %s2015_s26  ;;  %p2022_p3 = scmp.lt.u32.totalorder %s2015_s26, %s2765_s4 }
  0x1a   : > { %p2017_p0 = pneg %p2248_p12 }
  0x1c   : > { %p2018_p1 = pnand %p2017_p0, %p2016_p13 }
  0x1e   : > { %p2019_p2 = pneg %p2018_p1 }
  0x20   : > { %p2024_p4 = pnand %p2022_p3, %p2019_p2 }
  0x22   : > { %2027 = shalt.err (!%p2024_p4)
}
  0x23   : > { %s2028_s23 = scalar_lea.vmem %s338_s17, 3072  ;;  %p2036_p9 = scmp.lt.s32.totalorder %s338_s17, %s338_s17 }
  0x24   : > { %p2029_p7 = scmp.ne.s32.totalorder %s338_s17, %s2028_s23  ;;  %p2037_p6 = scmp.lt.s32.totalorder %s2028_s23, %s2028_s23 }
  0x26   : > { %p2031_p8 = pnand %p2029_p7, %p2017_p0  ;;  %p2038_p5 = por %p2037_p6, %p2036_p9 }
  0x28   : > { %p2032_p11 = pneg %p2031_p8 }
  0x2a   : > { %p2039_p10 = pnand %p2038_p5, %p2032_p11 }
  0x2c   : > { %2042 = shalt.err (!%p2039_p10)
}
  0x2d   : > { %s2112_s19 = smov 128   ;;  %s2113_s20 = smov 8  }
  0x2e   : > { %1857 = dma.hbm_to_vmem [thread:$0]  (!%p2248_p12), %s2765_s4, 3072, %s338_s17, [#allocation3], %s2112_s19, %s2112_s19, %s2113_s20  }
  0x2f   : > { %p2766_p13 = scmp.ne.s32.totalorder %s2763_s15, 0 }
  0x30   : > { %p2767_p1 = scmp.eq.s32.totalorder (!%p2766_p13), %s2212_s25, 0 }
  0x31   : > { %392 = sbr.rel (%p2766_p13) target bundleno = 3629 (0xe2d), region = 68 }
  0x38   : > { %2088 = dma.done.wait (%p2767_p1), [#allocation3], 3072   ;;  %p2768_p0 = pmov %p2767_p1 }
  0x39   : > { %s1727_s23 = sshll.u32 %s2212_s25, 1  ;;  %v2114_v0 = vmov 0   ;;  %v1916_v1 = vld [vmem:[%s2740_s2 + $0x4] ss:$8 sps:$4 sm:$0xff]   ;;  %v1918_v2 = vld [vmem:[%s2740_s2] ss:$8 sps:$4 sm:$0xff]   ;;  %v463_v37 = vlaneseq }
  0x3a   : > { %2090 = vsyncadd (%p2768_p0), [#allocation3], 4294964224  ;;  %534 = vmatprep.mubr.bf16.mxu1 %v2114_v0  ;;  %p440_p5 = scmp.lt.s32.totalorder %s1727_s23, 3  ;;  %502 = vmatprep.subr.bf16.mxu1 %v1916_v1  ;;  %v1919_v3 = vld [vmem:[%s2740_s2 + $0x14] ss:$8 sps:$4 sm:$0xff]   ;;  %vm498_vm0 = vcmask 261120  }
  0x3b   : > { %503 = vmatpush1.bf16.msra.mxu1 %v1918_v2  ;;  %v1921_v4 = vld [vmem:[%s2740_s2 + $0x10] ss:$8 sps:$4 sm:$0xff]   ;;  %v1925_v5 = vld [vmem:[#allocation2 + $0x4] ss:$8 sps:$4 sm:$0xff]   ;;  %v1923_v7 = vld [vmem:[#allocation2] ss:$8 sps:$4 sm:$0xff]  }
  0x3c   : > { %s2777_s23 = smov (!%p440_p5, %s1727_s23), 3  ;;  %504 = vmatprep.subr.bf16.mxu1 %v1919_v3  ;;  %v1928_v8 = vld [vmem:[#allocation2 + $0x14] ss:$8 sps:$4 sm:$0xff]   ;;  %v1926_v9 = vld [vmem:[#allocation2 + $0x10] ss:$8 sps:$4 sm:$0xff]   ;;  %v1959_v30 = vld [vmem:[%s2744_s6] sm:$0xff]  }
  0x3d   : > { %s1728_s30 = sshll.u32 %s2777_s23, 2  ;;  %v1931_v10 = vld [vmem:[#allocation2 + $0x24] ss:$8 sps:$4 sm:$0xff]   ;;  %v1929_v11 = vld [vmem:[#allocation2 + $0x20] ss:$8 sps:$4 sm:$0xff]   ;;  %v2115_v31 = vmov 0.0  }
  0x3e   : > { %s443_s20 = scalar_lea.vmem %s2738_s0, %s1728_s30  ;;  %v1934_v12 = vld [vmem:[#allocation2 + $0x34] ss:$8 sps:$4 sm:$0xff]   ;;  %v1932_v13 = vld [vmem:[#allocation2 + $0x30] ss:$8 sps:$4 sm:$0xff]   ;;  %v1937_v14 = vld [vmem:[#allocation2 + $0x44] ss:$8 sps:$4 sm:$0xff]   ;;  %1816 = vmatprep.subr.bf16.mxu0 %v2115_v31 }
  0x3f   : > { %v1922_v6 = vld [vmem:[%s443_s20] sm:$0xff]   ;;  %505 = vmatpush1.bf16.msra.mxu1 %v1921_v4  ;;  %v1940_v16 = vld [vmem:[#allocation2 + $0x54] ss:$8 sps:$4 sm:$0xff]   ;;  %v1938_v17 = vld [vmem:[#allocation2 + $0x50] ss:$8 sps:$4 sm:$0xff]   ;;  %1817 = vmatpush3.bf16.msra.mxu0 %v1959_v30  ;;  %v464_v38 = vshrl.u32 %v463_v37, 7 }
  0x40   : > { %711 = vmatprep.subr.bf16.mxu1 %v1925_v5  ;;  %v1935_v15 = vld [vmem:[#allocation2 + $0x40] ss:$8 sps:$4 sm:$0xff]   ;;  %v1943_v18 = vld [vmem:[#allocation2 + $0x64] ss:$8 sps:$4 sm:$0xff]   ;;  %v1946_v20 = vld [vmem:[#allocation2 + $0x74] ss:$8 sps:$4 sm:$0xff]   ;;  %1818 = vmatprep.subr.bf16.mxu0 %v2115_v31 }
  0x41   : > { %v1941_v19 = vld [vmem:[#allocation2 + $0x60] ss:$8 sps:$4 sm:$0xff]   ;;  %v1944_v21 = vld [vmem:[#allocation2 + $0x70] ss:$8 sps:$4 sm:$0xff]   ;;  %v1949_v22 = vld [vmem:[#allocation2 + $0x84] ss:$8 sps:$4 sm:$0xff]  }
  0x42   : > { %1736 = vmatmul.mubr.msk.bf16.vlgmr.msra.gmra.mrb[0].mxu1 %vm498_vm0, %v1922_v6  ;;  %v1947_v23 = vld [vmem:[#allocation2 + $0x80] ss:$8 sps:$4 sm:$0xff]   ;;  %v1952_v24 = vld [vmem:[#allocation2 + $0x94] ss:$8 sps:$4 sm:$0xff]   ;;  %v1950_v25 = vld [vmem:[#allocation2 + $0x90] ss:$8 sps:$4 sm:$0xff]  }
  0x43   : > { %712 = vmatpush1.bf16.msra.mxu1 %v1923_v7  ;;  %v1955_v26 = vld [vmem:[#allocation2 + $0xa4] ss:$8 sps:$4 sm:$0xff]   ;;  %v1953_v27 = vld [vmem:[#allocation2 + $0xa0] ss:$8 sps:$4 sm:$0xff]   ;;  %v1958_v28 = vld [vmem:[#allocation2 + $0xb4] ss:$8 sps:$4 sm:$0xff]  }
  0x44   : > { %713 = vmatprep.subr.bf16.mxu1 %v1928_v8  ;;  %v1956_v29 = vld [vmem:[#allocation2 + $0xb0] ss:$8 sps:$4 sm:$0xff]   ;;  %v1960_v32 = vld [vmem:[%s2744_s6 + $0x8] sm:$0xff]   ;;  %v1963_v35 = vld [vmem:[%s2744_s6 + $0x20] sm:$0xff]   ;;  %v465_v39 = vsub.s32 0, %v464_v38  ;;  %v469_v41 = vsub.s32 1, %v464_v38 }
  0x45   : > { %1819 = vmatpush3.bf16.msra.mxu0 %v1960_v32  ;;  %v1961_v33 = vld [vmem:[%s2744_s6 + $0x10] sm:$0xff]   ;;  %v1962_v34 = vld [vmem:[%s2744_s6 + $0x18] sm:$0xff]   ;;  %v1964_v36 = vld [vmem:[%s2744_s6 + $0x28] sm:$0xff]   ;;  %vm707_vm1 = vcmask 523264   ;;  %vm2116_vm2 = vmmov 0   ;;  %s1730_s19 = sshll.u32 %s2777_s23, 3 }
  0x46   : > { %1820 = vmatprep.subr.bf16.mxu0 %v2115_v31  ;;  %v461_v40 = vld [vmem:[%s2741_s3] sm:$0x3]  ;;  %v1965_v58 = vld [vmem:[%s2744_s6 + $0x30] sm:$0xff]   ;;  %v1966_v59 = vld [vmem:[%s2744_s6 + $0x38] sm:$0xff]   ;;  %1832 = vmatprep.mubr.msk.bf16.mxu0 %vm2116_vm2, %v2115_v31  ;;  %s449_s29 = scalar_lea.vmem %s2739_s1, %s1730_s19  ;;  %vm1028_vm3 = vcmask 39936   ;;  %vm2117_vm9 = vmmov 1  }
  0x47   : > { %714 = vmatpush1.bf16.msra.mxu1 %v1926_v9  ;;  %v466_v42 = vrot.slane %v461_v40, %v465_v39  ;;  %v470_v43 = vrot.slane %v461_v40, %v469_v41  ;;  %v575_v60 = vld [vmem:[%s2743_s5] sm:$0x3]  ;;  %s2119_s15 = smov 5   ;;  %s2120_s19 = smov 8  }
  0x48   : > { %715 = vmatprep.subr.bf16.mxu1 %v1931_v10  ;;  %v580_v61 = vrot.slane %v575_v60, %v465_v39  ;;  %v584_v62 = vrot.slane %v575_v60, %v469_v41  ;;  %s2121_s20 = smov 123   ;;  %s2122_s28 = smov 120  }
  0x49   : > { %1821 = vmatpush3.bf16.msra.mxu0 %v1961_v33  ;;  %v1762_v33 = vld [vmem:[%s2745_s7] ss:$0 sm:$0xff]  ;;  %s436_s23 = sand.u32 1, %s2101_s22   ;;  %s1802_s17 = sshll.u32 %s2212_s25, 8 }
  0x4a   : > { %1822 = vmatprep.subr.bf16.mxu0 %v2115_v31  ;;  %s1726_s4 = sshll.u32 %s436_s23, 4  ;;  %s2693_s26 = scalar_lea.hbm %s2750_s12, %s1802_s17 }
  0x4b   : > { %716 = vmatpush1.bf16.msra.mxu1 %v1929_v11  ;;  %s438_s27 = scalar_lea.vmem [#allocation5], %s1726_s4  ;;  %s2696_s25 = scalar_lea.sflag [#allocation4], %s436_s23 }
  0x4c   : > { %717 = vmatprep.subr.bf16.mxu1 %v1934_v12  ;;  %v1967_v12 = vld [vmem:[%s2746_s8] sm:$0xff]   ;;  %s1634_s30 = sshll.u32 %s438_s27, 4  ;;  %p2769_p9 = scmp.ne.s32.totalorder %s2761_s13, 0  ;;  %s2686_s30 = int_to_ptr.vmem [resolvable:$true] %s1634_s30 }
  0x4d   : > { %1823 = vmatpush3.bf16.msra.mxu0 %v1962_v34  ;;  %s2043_s16 = scalar_lea.vmem %s2686_s30, 256 }
  0x4e   : > { %1824 = vmatprep.subr.bf16.mxu0 %v2115_v31  ;;  %p2044_p6 = scmp.ne.s32.totalorder %s2686_s30, %s2043_s16 }
  0x4f   : > { %718 = vmatpush1.bf16.msra.mxu1 %v1932_v13 }
  0x50   : > { %719 = vmatprep.subr.bf16.mxu1 %v1937_v14  ;;  %p2045_p10 = pnand %p2044_p6, %p2769_p9 }
  0x51   : > { %1825 = vmatpush3.bf16.msra.mxu0 %v1963_v35 }
  0x52   : > { %1826 = vmatprep.subr.bf16.mxu0 %v2115_v31  ;;  %p2046_p12 = pneg %p2045_p10 }
  0x53   : > { %720 = vmatpush1.bf16.msra.mxu1 %v1935_v15  ;;  %v1968_v15 = vld [vmem:[%s2746_s8 + $0x8] sm:$0xff]  }
  0x54   : > { %721 = vmatprep.subr.bf16.mxu1 %v1940_v16  ;;  %v1969_v16 = vld [vmem:[%s2746_s8 + $0x10] sm:$0xff]  }
  0x55   : > { %1827 = vmatpush3.bf16.msra.mxu0 %v1964_v36 }
  0x56   : > { %1828 = vmatprep.subr.bf16.mxu0 %v2115_v31 }
  0x57   : > { %722 = vmatpush1.bf16.msra.mxu1 %v1938_v17  ;;  %v1970_v17 = vld [vmem:[%s2746_s8 + $0x18] sm:$0xff]  }
  0x58   : > { %723 = vmatprep.subr.bf16.mxu1 %v1943_v18  ;;  %v1971_v18 = vld [vmem:[%s2746_s8 + $0x20] sm:$0xff]  }
  0x59   : > { %1829 = vmatpush3.bf16.msra.mxu0 %v1965_v58 }
  0x5a   : > { %1830 = vmatprep.subr.bf16.mxu0 %v2115_v31 }
  0x5b   : > { %724 = vmatpush1.bf16.msra.mxu1 %v1941_v19  ;;  %v1972_v19 = vld [vmem:[%s2746_s8 + $0x28] sm:$0xff]  }
  0x5c   : > { %725 = vmatprep.subr.bf16.mxu1 %v1946_v20  ;;  %v1973_v20 = vld [vmem:[%s2746_s8 + $0x30] sm:$0xff]  }
  0x5d   : > { %1831 = vmatpush3.bf16.msra.mxu0 %v1966_v59 }
  0x5e   : > { %981 = vmatprep.subr.bf16.mxu0 %v2114_v0 }
  0x5f   : > { %726 = vmatpush1.bf16.msra.mxu1 %v1944_v21  ;;  %v1974_v21 = vld [vmem:[%s2746_s8 + $0x38] sm:$0xff]  }
  0x60   : > { %727 = vmatprep.subr.bf16.mxu1 %v1949_v22  ;;  %v1975_v22 = vld [vmem:[%s2746_s8 + $0x40] sm:$0xff]  }
  0x63   : > { %728 = vmatpush1.bf16.msra.mxu1 %v1947_v23  ;;  %v1976_v23 = vld [vmem:[%s2746_s8 + $0x48] sm:$0xff]  }
  0x64   : > { %729 = vmatprep.subr.bf16.mxu1 %v1952_v24  ;;  %v1977_v24 = vld [vmem:[%s2746_s8 + $0x50] sm:$0xff]  }
  0x67   : > { %730 = vmatpush1.bf16.msra.mxu1 %v1950_v25  ;;  %v1978_v25 = vld [vmem:[%s2746_s8 + $0x58] sm:$0xff]  }
  0x68   : > { %731 = vmatprep.subr.bf16.mxu1 %v1955_v26  ;;  %v2392_v26 = vld [vmem:[%s449_s29] sm:$0xff] }
  0x69   : > { %vm1024_vm4 = vcmp.gt.s32.totalorder %v2392_v26, 0 }
  0x6b   : > { %732 = vmatpush1.bf16.msra.mxu1 %v1953_v27  ;;  %v2394_v27 = vld [vmem:[%s449_s29 + $0x8] sm:$0xff]  ;;  %s2123_s29 = smov 1  }
  0x6c   : > { %733 = vmatprep.subr.bf16.mxu1 %v1958_v28  ;;  %vm1025_vm5 = vcmp.gt.s32.totalorder %v2394_v27, 0  ;;  %v2401_v28 = vsel %vm1024_vm4, 1.0, %v2115_v31 }
  0x6d   : > { %v1029_v30 = vsel %vm1028_vm3, %v2401_v28, -inf }
  0x6e   : > { %1030 = vmax.xlane.f32.xlu0 %v1029_v30 }
  0x6f   : > { %734 = vmatpush1.bf16.msra.mxu1 %v1956_v29  ;;  %v2406_v29 = vsel %vm1025_vm5, 1.0, %v2115_v31 }
  0x70   : > { %1836 = vmatprep.subr.bf16.mxu1 %v2115_v31  ;;  %v1032_v32 = vsel %vm1028_vm3, %v2406_v29, -inf }
  0x72   : > { %1033 = vmax.xlane.f32.xlu0 %v1032_v32 }
 0x115   : > { %v536_v44 = vpop.f32.mrb[0].mxu1 }
 0x116   : > { %v537_v45 = vadd.f32 %v536_v44, %v466_v42  ;;  %v538_v46 = vpop.f32.mrb[1].mxu1  ;;  %v1031_v44 = vpop.xlane.xlu0 %1030 }
 0x117   : > { %v539_v47 = vadd.f32 %v538_v46, %v470_v43  ;;  %v540_v48 = vpop.f32.mrb[2].mxu1  ;;  %vm1035_vm6 = vcmp.gt.f32.partialorder %v1031_v44, 0.0 }
 0x118   : > { %v541_v49 = vadd.f32 %v540_v48, %v466_v42  ;;  %v542_v50 = vpop.f32.mrb[3].mxu1  ;;  %v545_v52 = vmax.f32 %v537_v45, 0.0  ;;  %v2416_v45 = vand.u32 127, %v463_v37  ;;  %vm1037_vm10 = vmxor %vm1035_vm6, %vm2117_vm9 }
 0x119   : > { %v543_v51 = vadd.f32 %v542_v50, %v470_v43  ;;  %v547_v54 = vmax.f32 %v539_v47, 0.0  ;;  %v1771_v47 = vld [vmem:[%s2747_s9] ss:$0 sm:$0xff] }
 0x11a   : > { %v546_v53 = vmax.f32 %v541_v49, 0.0  ;;  %v1034_v46 = vpop.xlane.xlu0 %1033  ;;  %vm1039_vm8 = vcmp.eq.s32.totalorder %v2416_v45, 0 }
 0x11b   : > { %v548_v55 = vmax.f32 %v543_v51, 0.0  ;;  %vm1036_vm7 = vcmp.gt.f32.partialorder %v1034_v46, 0.0  ;;  %vm1044_vm12 = vmand %vm1037_vm10, %vm1039_vm8  ;;  %vm1149_vm10 = vcmask 1041408  }
 0x11c   : > { %v549_v56 = vpack.c.bf16 %v546_v53, %v545_v52  ;;  %vm1038_vm11 = vmxor %vm1036_vm7, %vm2117_vm9 }
 0x11d   : > { %v550_v57 = vpack.c.bf16 %v548_v55, %v547_v54  ;;  %vm1045_vm13 = vmand %vm1038_vm11, %vm1039_vm8  ;;  %vm1150_vm11 = vcmask 1042432  }
 0x11e   : > { %vm1046_vm14 = vmor %vm1024_vm4, %vm1044_vm12  ;;  %vm1207_vm12 = vcmask 64552  }
 0x11f   : > { %1761 = vmatprep.mubr.msk.bf16.mxu1 %vm707_vm1, %v550_v57  ;;  %vm1047_vm15 = vmor %vm1025_vm5, %vm1045_vm13 }
 0x120   : > { %744 = vmatmul.mubr.bf16.vlgmr.msra.gmra.mrb[4].mxu1 %v549_v56 }
 0x121   : > { %1838 = vmatprep.mubr.msk.bf16.mxu1 %vm2116_vm2, %v2115_v31 }
 0x1f3   : > { %v745_v63 = vpop.f32.mrb[4].mxu1 }
 0x1f4   : > { %v746_v1 = vadd.f32 %v745_v63, %v580_v61  ;;  %v747_v2 = vpop.f32.mrb[5].mxu1 }
 0x1f5   : > { %v748_v3 = vadd.f32 %v747_v2, %v584_v62  ;;  %v749_v4 = vpop.f32.mrb[6].mxu1 }
 0x1f6   : > { %v750_v5 = vadd.f32 %v749_v4, %v580_v61  ;;  %v751_v6 = vpop.f32.mrb[7].mxu1  ;;  %v754_v8 = vmax.f32 %v746_v1, 0.0 }
 0x1f7   : > { %v752_v7 = vadd.f32 %v751_v6, %v584_v62  ;;  %v755_v10 = vmax.f32 %v748_v3, 0.0 }
 0x1f8   : > { %v756_v9 = vmax.f32 %v750_v5, 0.0 }
 0x1f9   : > { %v757_v11 = vmax.f32 %v752_v7, 0.0 }
 0x1fa   : > { %v758_v13 = vpack.c.bf16 %v756_v9, %v754_v8 }
 0x1fb   : > { %v874_v14 = vpack.c.bf16 %v757_v11, %v755_v10 }
 0x1fc   : > { %1833 = vmatmul.mubr.bf16.vlgmr.msra.gmra.mrb[0].mxu0 %v758_v13 }
 0x1fd   : > { %1784 = vmatprep.mubr.msk.bf16.mxu0 %vm707_vm1, %v874_v14  ;;  %982 = vmatpush1.bf16.msra.mxu0 %v1967_v12  ;;  %v2118_v12 = vmov 65535   ;;  %v1145_v14 = vld [vmem:[%s2748_s10] sm:$0x7] }
 0x1fe   : > { %983 = vmatprep.subr.bf16.mxu0 %v2114_v0  ;;  %v1151_v13 = vsel %vm1149_vm10, 4294967295, %v2118_v12 }
 0x201   : > { %984 = vmatpush1.bf16.msra.mxu0 %v1968_v15  ;;  %v1152_v15 = vsel %vm1150_vm11, %v1151_v13, 0 }
 0x202   : > { %985 = vmatprep.subr.bf16.mxu0 %v2114_v0 }
 0x205   : > { %986 = vmatpush1.bf16.msra.mxu0 %v1969_v16  ;;  %v1154_v16 = vand.u32 %v1152_v15, %v1145_v14 }
 0x206   : > { %987 = vmatprep.subr.bf16.mxu0 %v2114_v0 }
 0x207   : > { %1837 = vmatpush3.bf16.msra.mxu1 %v1154_v16 }
 0x208   : > { %1842 = vmatprep.subr.bf16.mxu1 %v2115_v31 }
 0x209   : > { %988 = vmatpush1.bf16.msra.mxu0 %v1970_v17  ;;  %v1208_v17 = vsel %vm1207_vm12, %v2401_v28, -inf }
 0x20a   : > { %989 = vmatprep.subr.bf16.mxu0 %v2114_v0 }
 0x20d   : > { %990 = vmatpush1.bf16.msra.mxu0 %v1971_v18  ;;  %v1211_v18 = vsel %vm1207_vm12, %v2406_v29, -inf }
 0x20e   : > { %991 = vmatprep.subr.bf16.mxu0 %v2114_v0 }
 0x211   : > { %992 = vmatpush1.bf16.msra.mxu0 %v1972_v19 }
 0x212   : > { %993 = vmatprep.subr.bf16.mxu0 %v2114_v0 }
 0x215   : > { %994 = vmatpush1.bf16.msra.mxu0 %v1973_v20 }
 0x216   : > { %995 = vmatprep.subr.bf16.mxu0 %v2114_v0 }
 0x219   : > { %996 = vmatpush1.bf16.msra.mxu0 %v1974_v21 }
 0x21a   : > { %997 = vmatprep.subr.bf16.mxu0 %v2114_v0 }
 0x21d   : > { %998 = vmatpush1.bf16.msra.mxu0 %v1975_v22 }
 0x21e   : > { %999 = vmatprep.subr.bf16.mxu0 %v2114_v0 }
 0x221   : > { %1000 = vmatpush1.bf16.msra.mxu0 %v1976_v23 }
 0x222   : > { %1001 = vmatprep.subr.bf16.mxu0 %v2114_v0 }
 0x225   : > { %1002 = vmatpush1.bf16.msra.mxu0 %v1977_v24 }
 0x226   : > { %1003 = vmatprep.subr.bf16.mxu0 %v2114_v0 }
 0x229   : > { %1004 = vmatpush1.bf16.msra.mxu0 %v1978_v25 }
 0x2cf   : > { %v864_v34 = vpop.f32.mrb[0].mxu0 }
 0x2d0   : > { %v865_v35 = vadd.f32 %v1762_v33, %v864_v34  ;;  %v1834_v36 = vpop.f32.mrb[1].mxu0 }
 0x2d1   : > { %v867_v38 = vpop.f32.mrb[2].mxu0 }
 0x2d2   : > { %v868_v39 = vadd.f32 %v1762_v33, %v867_v38  ;;  %v1835_v40 = vpop.f32.mrb[3].mxu0  ;;  %v871_v41 = vmax.f32 %v865_v35, 0.0 }
 0x2d4   : > { %v872_v42 = vmax.f32 %v868_v39, 0.0 }
 0x2d6   : > { %v873_v43 = vpack.c.bf16 %v872_v42, %v871_v41 }
 0x2d8   : > { %1014 = vmatmul.mubr.bf16.vlgmr.msra.gmra.mrb[4].mxu0 %v873_v43 }
 0x3ab   : > { %v1015_v37 = vpop.f32.mrb[4].mxu0 }
 0x3ac   : > { %v2430_v48 = vadd.f32 %v1771_v47, %v1015_v37  ;;  %v1017_v49 = vpop.f32.mrb[5].mxu0 }
 0x3ad   : > { %v1018_v50 = vpop.f32.mrb[6].mxu0 }
 0x3ae   : > { %v2434_v51 = vadd.f32 %v1771_v47, %v1018_v50  ;;  %v1020_v52 = vpop.f32.mrb[7].mxu0  ;;  %v2437_v53 = vsel %vm1046_vm14, %v2430_v48, -1e+30 }
 0x3af   : > { %v1050_v54 = vsel %vm1028_vm3, %v2437_v53, -inf }
 0x3b0   : > { %1051 = vmax.xlane.f32.xlu1 %v1050_v54  ;;  %v2442_v55 = vsel %vm1047_vm15, %v2434_v51, -1e+30 }
 0x3b1   : > { %v1053_v56 = vsel %vm1028_vm3, %v2442_v55, -inf }
 0x3b4   : > { %1054 = vmax.xlane.f32.xlu1 %v1053_v56 }
 0x43d   : > { %v2446_v57 = vpop.xlane.xlu1 %1051 }
 0x43e   : > { %vm1056_vm0 = vcmp.ge.f32.partialorder %v2437_v53, %v2446_v57 }
 0x43f   : > { %v1058_v58 = vsel %vm1056_vm0, %v2416_v45, 5 }
 0x440   : > { %v1060_v59 = vsel %vm1028_vm3, %v1058_v58, 2147483647 }
 0x441   : > { %v2452_v60 = vpop.xlane.xlu1 %1054  ;;  %v1062_v61 = vshra.s32 %v1060_v59, 16  ;;  %v1061_v4 = vand.u32 65535, %v1060_v59 }
 0x442   : > { %vm1057_vm1 = vcmp.ge.f32.partialorder %v2442_v55, %v2452_v60 }
 0x443   : > { %v1059_v62 = vsel %vm1057_vm1, %v2416_v45, 5  ;;  %v1064_v63 = vcvt.s32.f32 %v1062_v61  ;;  %v1063_v6 = vcvt.s32.f32 %v1061_v4 }
 0x444   : > { %v1075_v1 = vsel %vm1028_vm3, %v1059_v62, 2147483647 }
 0x445   : > { %1065 = vmin.xlane.f32.xlu0 %v1064_v63  ;;  %v1077_v2 = vshra.s32 %v1075_v1, 16  ;;  %v1076_v7 = vand.u32 65535, %v1075_v1 }
 0x447   : > { %v1079_v3 = vcvt.s32.f32 %v1077_v2  ;;  %v1078_v10 = vcvt.s32.f32 %v1076_v7 }
 0x449   : > { %1080 = vmin.xlane.f32.xlu1 %v1079_v3 }
 0x4d2   : > { %v1066_v5 = vpop.xlane.xlu0 %1065 }
 0x4d3   : > { %vm1067_vm6 = vcmp.eq.f32.partialorder %v1064_v63, %v1066_v5  ;;  %v1072_v19 = vcvt.f32.s32 %v1066_v5 }
 0x4d4   : > { %v1068_v8 = vsel %vm1067_vm6, %v1063_v6, inf }
 0x4d5   : > { %1069 = vmin.xlane.f32.xlu0 %v1068_v8  ;;  %v1073_v21 = vshll.u32 %v1072_v19, 16 }
 0x4d6   : > { %v1081_v9 = vpop.xlane.xlu1 %1080 }
 0x4d7   : > { %vm1082_vm7 = vcmp.eq.f32.partialorder %v1079_v3, %v1081_v9  ;;  %v1087_v22 = vcvt.f32.s32 %v1081_v9 }
 0x4d8   : > { %v1083_v11 = vsel %vm1082_vm7, %v1078_v10, inf }
 0x4d9   : > { %1084 = vmin.xlane.f32.xlu1 %v1083_v11  ;;  %1209 = vmax.xlane.f32.xlu0 %v1208_v17  ;;  %v1088_v30 = vshll.u32 %v1087_v22, 16 }
 0x4dd   : > { %1212 = vmax.xlane.f32.xlu1 %v1211_v18 }
 0x562   : > { %v1070_v20 = vpop.xlane.xlu0 %1069 }
 0x563   : > { %v1071_v23 = vcvt.f32.s32 %v1070_v20  ;;  %v1368_v20 = vld [vmem:[%s2749_s11] sm:$0xf] }
 0x565   : > { %v2466_v24 = vadd.s32 %v1073_v21, %v1071_v23 }
 0x566   : > { %v1085_v25 = vpop.xlane.xlu1 %1084  ;;  %v1210_v40 = vpop.xlane.xlu0 %1209 }
 0x567   : > { %vm1106_vm13 = vcmp.eq.s32.totalorder %v2416_v45, %v2466_v24  ;;  %v1086_v32 = vcvt.f32.s32 %v1085_v25  ;;  %vm1214_vm15 = vcmp.gt.f32.partialorder %v1210_v40, 0.0 }
 0x568   : > { %v2473_v34 = vsel %vm1106_vm13, 1.0, %v2115_v31  ;;  %vm1216_vm0 = vmxor %vm1214_vm15, %vm2117_vm9 }
 0x569   : > { %v2470_v33 = vadd.s32 %v1088_v30, %v1086_v32  ;;  %v1787_v36 = vclamps-f32 %v2473_v34, 5.0  ;;  %vm1222_vm1 = vmand %vm1216_vm0, %vm1039_vm8 }
 0x56a   : > { %v1224_v41 = vsel %vm1222_vm1, 1, %v2114_v0  ;;  %v1213_v42 = vpop.xlane.xlu1 %1212 }
 0x56b   : > { %vm1107_vm14 = vcmp.eq.s32.totalorder %v2416_v45, %v2470_v33  ;;  %1226 = vrot.lane.b32.xlu1 %v1224_v41, %s2119_s15  ;;  %vm1215_vm6 = vcmp.gt.f32.partialorder %v1213_v42, 0.0 }
 0x56c   : > { %v2478_v35 = vsel %vm1107_vm14, 1.0, %v2115_v31  ;;  %vm1217_vm7 = vmxor %vm1215_vm6, %vm2117_vm9 }
 0x56d   : > { %v1788_v38 = vclamps-f32 %v2478_v35, 5.0 }
 0x56f   : > { %v1144_v39 = vpack.c.bf16 %v1788_v38, %v1787_v36 }
 0x571   : > { %1839 = vmatmul.mubr.msk.bf16.vlgmr.msra.gmra.mrb[8].mxu1 %vm1028_vm3, %v1144_v39 }
 0x572   : > { %1844 = vmatprep.mubr.msk.bf16.mxu1 %vm2116_vm2, %v2115_v31  ;;  %vm1223_vm2 = vmand %vm1217_vm7, %vm1039_vm8 }
 0x573   : > { %v1225_v37 = vsel %vm1223_vm2, 1, %v2114_v0  ;;  %vm1428_vm2 = vcmask 97344  }
 0x574   : > { %v1429_v42 = vsel %vm1428_vm2, %v2401_v28, -inf }
 0x5dd   : > { %v1227_v49 = vpop.permute.xlu1 %1226 }
 0x5de   : > { %vm1230_vm10 = vcmp.ne.s32.totalorder %v1227_v49, 0 }
 0x5df   : > { %vm1232_vm11 = vmor %vm1024_vm4, %vm1230_vm10 }
 0x644   : > { %v1190_v43 = vpop.f32.mrb[8].mxu1 }
 0x645   : > { %1199 = vrot.lane.b32.xlu0 %v1190_v43, %s2119_s15  ;;  %v1840_v44 = vpop.f32.mrb[9].mxu1 }
 0x646   : > { %v1193_v46 = vpop.f32.mrb[10].mxu1 }
 0x647   : > { %1201 = vrot.lane.b32.xlu1 %v1193_v46, %s2119_s15  ;;  %v1841_v47 = vpop.f32.mrb[11].mxu1 }
 0x648   : > { %v1432_v47 = vsel %vm1428_vm2, %v2406_v29, -inf }
 0x64b   : > { %1228 = vrot.lane.b32.xlu1 %v1225_v37, %s2119_s15 }
 0x6b7   : > { %v1200_v50 = vpop.permute.xlu0 %1199 }
 0x6b8   : > { %v1205_v52 = vadd.f32 %v1200_v50, %v2430_v48 }
 0x6b9   : > { %v1202_v54 = vpop.permute.xlu1 %1201 }
 0x6ba   : > { %v2500_v56 = vsel %vm1232_vm11, %v1205_v52, -1e+30  ;;  %v1206_v61 = vadd.f32 %v1202_v54, %v2434_v51  ;;  %vm1369_vm11 = vcmask 64512  }
 0x6bb   : > { %v1236_v58 = vsel %vm1207_vm12, %v2500_v56, -inf }
 0x6bc   : > { %1237 = vmax.xlane.f32.xlu0 %v1236_v58 }
 0x6bd   : > { %v1229_v59 = vpop.permute.xlu1 %1228 }
 0x6be   : > { %vm1231_vm13 = vcmp.ne.s32.totalorder %v1229_v59, 0 }
 0x6bf   : > { %vm1233_vm14 = vmor %vm1025_vm5, %vm1231_vm13 }
 0x6c0   : > { %v2507_v62 = vsel %vm1233_vm14, %v1206_v61, -1e+30 }
 0x6c1   : > { %v1239_v63 = vsel %vm1207_vm12, %v2507_v62, -inf }
 0x6c2   : > { %1240 = vmax.xlane.f32.xlu1 %v1239_v63 }
 0x6d2   : > { %1244 = vrot.lane.b32.xlu0 %v2416_v45, %s2119_s15 }
 0x749   : > { %v2513_v1 = vpop.xlane.xlu0 %1237 }
 0x74a   : > { %vm1242_vm15 = vcmp.ge.f32.partialorder %v2500_v56, %v2513_v1 }
 0x74d   : > { %v1245_v2 = vpop.permute.xlu0 %1244 }
 0x74e   : > { %v1246_v3 = vsel %vm1242_vm15, %v1245_v2, 3 }
 0x74f   : > { %v1248_v4 = vsel %vm1207_vm12, %v1246_v3, 2147483647  ;;  %v2518_v5 = vpop.xlane.xlu1 %1240 }
 0x750   : > { %vm1243_vm0 = vcmp.ge.f32.partialorder %v2507_v62, %v2518_v5  ;;  %v1250_v6 = vshra.s32 %v1248_v4, 16  ;;  %v1249_v12 = vand.u32 65535, %v1248_v4 }
 0x751   : > { %v1247_v7 = vsel %vm1243_vm0, %v1245_v2, 3 }
 0x752   : > { %v1252_v8 = vcvt.s32.f32 %v1250_v6  ;;  %v1263_v9 = vsel %vm1207_vm12, %v1247_v7, 2147483647  ;;  %v1251_v14 = vcvt.s32.f32 %v1249_v12  ;;  %vm1373_vm12 = vcmask 1043456  }
 0x753   : > { %v1265_v10 = vshra.s32 %v1263_v9, 16  ;;  %v1264_v15 = vand.u32 65535, %v1263_v9  ;;  %v1375_v21 = vsel %vm1373_vm12, %v1368_v20, 0 }
 0x754   : > { %1253 = vmin.xlane.f32.xlu1 %v1252_v8  ;;  %1843 = vmatpush3.bf16.msra.mxu1 %v1375_v21 }
 0x755   : > { %v1267_v11 = vcvt.s32.f32 %v1265_v10  ;;  %v1266_v18 = vcvt.s32.f32 %v1264_v15 }
 0x758   : > { %1268 = vmin.xlane.f32.xlu1 %v1267_v11 }
 0x7e1   : > { %v1254_v13 = vpop.xlane.xlu1 %1253 }
 0x7e2   : > { %vm1255_vm1 = vcmp.eq.f32.partialorder %v1252_v8, %v1254_v13  ;;  %v1260_v22 = vcvt.f32.s32 %v1254_v13 }
 0x7e3   : > { %v1256_v16 = vsel %vm1255_vm1, %v1251_v14, inf }
 0x7e4   : > { %1257 = vmin.xlane.f32.xlu1 %v1256_v16  ;;  %v1261_v25 = vshll.u32 %v1260_v22, 16 }
 0x7e5   : > { %v1269_v17 = vpop.xlane.xlu1 %1268 }
 0x7e6   : > { %vm1270_vm6 = vcmp.eq.f32.partialorder %v1267_v11, %v1269_v17  ;;  %v1275_v30 = vcvt.f32.s32 %v1269_v17  ;;  %v1279_v17 = vsub.f32 %v2507_v62, %v2518_v5 }
 0x7e7   : > { %v1271_v19 = vsel %vm1270_vm6, %v1266_v18, inf }
 0x7e8   : > { %1272 = vmin.xlane.f32.xlu1 %v1271_v19  ;;  %v1276_v39 = vshll.u32 %v1275_v30, 16  ;;  %v1282_v19 = vmul.f32 1.442695, %v1279_v17 }
 0x7ec   : > { %1430 = vmax.xlane.f32.xlu1 %v1429_v42 }
 0x871   : > { %v1258_v23 = vpop.xlane.xlu1 %1257 }
 0x872   : > { %v1259_v32 = vcvt.f32.s32 %v1258_v23 }
 0x874   : > { %v2526_v36 = vadd.s32 %v1261_v25, %v1259_v32 }
 0x875   : > { %v1273_v38 = vpop.xlane.xlu1 %1272 }
 0x876   : > { %v1274_v40 = vcvt.f32.s32 %v1273_v38  ;;  %vm1303_vm7 = vcmp.eq.s32.totalorder %v2416_v45, %v2526_v36  ;;  %v1091_v38 = vsub.f32 %v2442_v55, %v2452_v60 }
 0x877   : > { %v2537_v43 = vsel %vm1303_vm7, 1.0, %v2115_v31 }
 0x878   : > { %v2530_v41 = vadd.s32 %v1276_v39, %v1274_v40  ;;  %v1094_v39 = vmul.f32 1.442695, %v1091_v38 }
 0x879   : > { %v1431_v61 = vpop.xlane.xlu1 %1430 }
 0x87a   : > { %vm1304_vm10 = vcmp.eq.s32.totalorder %v2416_v45, %v2530_v41  ;;  %vm1435_vm13 = vcmp.gt.f32.partialorder %v1431_v61, 0.0 }
 0x87b   : > { %v2540_v44 = vsel %vm1304_vm10, 1.0, %v2115_v31  ;;  %vm1437_vm14 = vmxor %vm1435_vm13, %vm2117_vm9 }
 0x87c   : > { %v1911_v46 = vpack.i.bf16 %v2540_v44, %v2537_v43  ;;  %vm1443_vm15 = vmand %vm1437_vm14, %vm1039_vm8 }
 0x87d   : > { %v1445_v29 = vsel %vm1443_vm15, 1, %v2114_v0  ;;  %vm1574_vm15 = vcmask 7168  }
 0x87e   : > { %1912 = vrot.lane.b32.xlu0 %v1911_v46, %s2119_s15  ;;  %1447 = vrot.lane.b32.xlu1 %v1445_v29, %s2120_s19 }
 0x89d   : > { %1433 = vmax.xlane.f32.xlu0 %v1432_v47 }
 0x8f0   : > { %v1913_v28 = vpop.permute.xlu0 %1912  ;;  %v1448_v8 = vpop.permute.xlu1 %1447 }
 0x8f1   : > { %v1915_v37 = vunpack.i.h.bf16 %v1913_v28  ;;  %v1914_v49 = vunpack.i.l.bf16 %v1913_v28  ;;  %vm1451_vm12 = vcmp.ne.s32.totalorder %v1448_v8, 0 }
 0x8f3   : > { %v1362_v50 = vsel %vm1028_vm3, %v2478_v35, %v1915_v37  ;;  %v1361_v52 = vsel %vm1028_vm3, %v2473_v34, %v1914_v49 }
 0x8f4   : > { %v1793_v54 = vclamps-f32 %v1362_v50, 5.0  ;;  %v1792_v58 = vclamps-f32 %v1361_v52, 5.0 }
 0x8f6   : > { %v1367_v59 = vpack.c.bf16 %v1793_v54, %v1792_v58 }
 0x8f8   : > { %1845 = vmatmul.mubr.msk.bf16.vlgmr.msra.gmra.mrb[12].mxu1 %vm1369_vm11, %v1367_v59  ;;  %v1090_v59 = vsub.f32 %v2437_v53, %v2446_v57 }
 0x8fa   : > { %v1092_v29 = vmul.f32 1.442695, %v1090_v59 }
 0x92a   : > { %v1434_v63 = vpop.xlane.xlu0 %1433 }
 0x92b   : > { %vm1436_vm0 = vcmp.gt.f32.partialorder %v1434_v63, 0.0 }
 0x92c   : > { %vm1438_vm1 = vmxor %vm1436_vm0, %vm2117_vm9  ;;  %vm1577_vm0 = vcmask 15360  }
 0x92d   : > { %vm1444_vm6 = vmand %vm1438_vm1, %vm1039_vm8 }
 0x92e   : > { %v1446_v7 = vsel %vm1444_vm6, 1, %v2114_v0  ;;  %vm1453_vm9 = vmor %vm1024_vm4, %vm1451_vm12  ;;  %v1278_v0 = vsub.f32 %v2500_v56, %v2513_v1  ;;  %vm1292_vm4 = vcmask 23552  }
 0x930   : > { %v1280_v26 = vmul.f32 1.442695, %v1278_v0 }
 0x932   : > { %1979 = vpow2.f32 %v1280_v26 }
 0x933   : > { %1981 = vpow2.f32 %v1282_v19 }
 0x93c   : > { %v1980_v56 = vpop.eup %1979 }
 0x93d   : > { %v1982_v1 = vpop.eup %1981 }
 0x9cb   : > { %v1411_v2 = vpop.f32.mrb[12].mxu1 }
 0x9cc   : > { %v1846_v3 = vpop.f32.mrb[13].mxu1  ;;  %1420 = vrot.lane.b32.xlu1 %v1411_v2, %s2120_s19 }
 0x9cd   : > { %v1414_v4 = vpop.f32.mrb[14].mxu1 }
 0x9ce   : > { %v1847_v6 = vpop.f32.mrb[15].mxu1 }
 0x9d0   : > { %1422 = vrot.lane.b32.xlu1 %v1414_v4, %s2120_s19 }
 0x9d4   : > { %1449 = vrot.lane.b32.xlu1 %v1446_v7, %s2120_s19 }
 0xa3e   : > { %v1421_v9 = vpop.permute.xlu1 %1420 }
 0xa3f   : > { %v1426_v10 = vadd.f32 %v1421_v9, %v2430_v48 }
 0xa41   : > { %v2567_v11 = vsel %vm1453_vm9, %v1426_v10, -1e+30 }
 0xa42   : > { %v1423_v12 = vpop.permute.xlu1 %1422  ;;  %v1457_v13 = vsel %vm1428_vm2, %v2567_v11, -inf }
 0xa43   : > { %1458 = vmax.xlane.f32.xlu0 %v1457_v13  ;;  %v1427_v15 = vadd.f32 %v1423_v12, %v2434_v51 }
 0xa46   : > { %v1450_v14 = vpop.permute.xlu1 %1449 }
 0xa47   : > { %vm1452_vm8 = vcmp.ne.s32.totalorder %v1450_v14, 0 }
 0xa48   : > { %vm1454_vm7 = vmor %vm1025_vm5, %vm1452_vm8  ;;  %vm1513_vm5 = vcmask 31744  }
 0xa49   : > { %v2576_v16 = vsel %vm1454_vm7, %v1427_v15, -1e+30 }
 0xa4a   : > { %v1460_v18 = vsel %vm1428_vm2, %v2576_v16, -inf }
 0xa4b   : > { %1461 = vmax.xlane.f32.xlu1 %v1460_v18 }
 0xa59   : > { %1286 = vrot.lane.b32.xlu0 %v1980_v56, %s2121_s20 }
 0xa5d   : > { %1288 = vrot.lane.b32.xlu0 %v1982_v1, %s2121_s20 }
 0xad0   : > { %v2584_v27 = vpop.xlane.xlu0 %1458 }
 0xad1   : > { %v1499_v20 = vsub.f32 %v2567_v11, %v2584_v27  ;;  %vm1463_vm10 = vcmp.ge.f32.partialorder %v2567_v11, %v2584_v27 }
 0xad3   : > { %v1501_v62 = vmul.f32 1.442695, %v1499_v20 }
 0xad4   : > { %v1287_v5 = vpop.permute.xlu0 %1286 }
 0xad5   : > { %1983 = vpow2.f32 %v1501_v62  ;;  %v1293_v21 = vsel %vm1292_vm4, %v1287_v5, 0.0 }
 0xad6   : > { %1294 = vadd.xlane.f32.xlu1 %v1293_v21 }
 0xad8   : > { %v1462_v22 = vpop.xlane.xlu1 %1461  ;;  %v1289_v40 = vpop.permute.xlu0 %1288 }
 0xad9   : > { %v1500_v23 = vsub.f32 %v2576_v16, %v1462_v22  ;;  %v1296_v42 = vsel %vm1292_vm4, %v1289_v40, 0.0  ;;  %vm1464_vm13 = vcmp.ge.f32.partialorder %v2576_v16, %v1462_v22 }
 0xadb   : > { %v1503_v25 = vmul.f32 1.442695, %v1500_v23 }
 0xadd   : > { %1985 = vpow2.f32 %v1503_v25 }
 0xade   : > { %1987 = vpow2.f32 %v1094_v39 }
 0xadf   : > { %v2590_v30 = vpop.eup %1983 }
 0xae0   : > { %1507 = vrot.lane.b32.xlu0 %v2590_v30, %s2122_s28 }
 0xae7   : > { %v1986_v32 = vpop.eup %1985 }
 0xae8   : > { %1509 = vrot.lane.b32.xlu0 %v1986_v32, %s2122_s28  ;;  %v2598_v46 = vpop.eup %1987 }
 0xae9   : > { %v1099_v47 = vsel %vm1028_vm3, %v2598_v46, 0.0 }
 0xb07   : > { %1297 = vadd.xlane.f32.xlu0 %v1296_v42 }
 0xb0b   : > { %1100 = vadd.xlane.f32.xlu0 %v1099_v47 }
 0xb52   : > { %v1508_v28 = vpop.permute.xlu0 %1507 }
 0xb53   : > { %v1514_v37 = vsel %vm1513_vm5, %v1508_v28, 0.0 }
 0xb54   : > { %1515 = vadd.xlane.f32.xlu1 %v1514_v37 }
 0xb5a   : > { %v1510_v49 = vpop.permute.xlu0 %1509 }
 0xb5b   : > { %v1517_v55 = vsel %vm1513_vm5, %v1510_v49, 0.0 }
 0xb5c   : > { %1518 = vadd.xlane.f32.xlu1 %v1517_v55 }
 0xb63   : > { %v1295_v60 = vpop.xlane.xlu1 %1294 }
 0xb64   : > { %1989 = vrcp.f32 %v1295_v60 }
 0xb6d   : > { %1465 = vrot.lane.b32.xlu1 %v2416_v45, %s2120_s19 }
 0xb6e   : > { %v1990_v50 = vpop.eup %1989 }
 0xb6f   : > { %v1301_v52 = vmul.f32 %v1990_v50, %v1980_v56 }
 0xb71   : > { %v1309_v54 = vmax.f32 %v1301_v52, 1.1920929e-07 }
 0xb73   : > { %v1311_v58 = vmin.f32 %v1309_v54, 0.9999999 }
 0xb75   : > { %1991 = vlog2.f32 %v1311_v58 }
 0xb76   : > { %1993 = vpow2.f32 %v1092_v29 }
 0xb7f   : > { %v1992_v61 = vpop.eup %1991 }
 0xb80   : > { %v1314_v63 = vmul.f32 0.6931472, %v1992_v61  ;;  %v1994_v3 = vpop.eup %1993 }
 0xb81   : > { %v1096_v4 = vsel %vm1028_vm3, %v1994_v3, 0.0 }
 0xb82   : > { %v2608_v2 = vmul.f32 %v1314_v63, %v1301_v52 }
 0xb91   : > { %1097 = vadd.xlane.f32.xlu1 %v1096_v4 }
 0xb94   : > { %v1298_v6 = vpop.xlane.xlu0 %1297 }
 0xb95   : > { %1995 = vrcp.f32 %v1298_v6 }
 0xb98   : > { %v1101_v23 = vpop.xlane.xlu0 %1100 }
 0xb9f   : > { %v1996_v7 = vpop.eup %1995 }
 0xba0   : > { %v1302_v8 = vmul.f32 %v1996_v7, %v1982_v1 }
 0xba2   : > { %v1310_v9 = vmax.f32 %v1302_v8, 1.1920929e-07 }
 0xba4   : > { %v1312_v10 = vmin.f32 %v1310_v9, 0.9999999 }
 0xba6   : > { %1997 = vlog2.f32 %v1312_v10 }
 0xbb0   : > { %v1998_v12 = vpop.eup %1997 }
 0xbb1   : > { %v2611_v13 = vmul.f32 0.6931472, %v1998_v12 }
 0xbb3   : > { %v1336_v53 = vmul.f32 %v2611_v13, %v1302_v8 }
 0xbb5   : > { %1341 = vrot.lane.b32.xlu1 %v1336_v53, %s2121_s20 }
 0xbb9   : > { %1319 = vrot.lane.b32.xlu1 %v1314_v63, %s2121_s20 }
 0xbe1   : > { %v1516_v57 = vpop.xlane.xlu1 %1515 }
 0xbe9   : > { %v1519_v0 = vpop.xlane.xlu1 %1518 }
 0xbea   : > { %1999 = vrcp.f32 %v1519_v0 }
 0xbed   : > { %v1466_v14 = vpop.permute.xlu1 %1465 }
 0xbee   : > { %v1467_v15 = vsel %vm1463_vm10, %v1466_v14, 4  ;;  %v1468_v26 = vsel %vm1464_vm13, %v1466_v14, 4 }
 0xbef   : > { %v1469_v17 = vsel %vm1428_vm2, %v1467_v15, 2147483647  ;;  %v2621_v18 = vsel %vm1428_vm2, %v1468_v26, 2147483647 }
 0xbf0   : > { %v1471_v19 = vshra.s32 %v1469_v17, 16  ;;  %v1486_v1 = vshra.s32 %v2621_v18, 16  ;;  %v1470_v6 = vand.u32 65535, %v1469_v17  ;;  %v1485_v53 = vand.u32 65535, %v2621_v18 }
 0xbf2   : > { %v1473_v56 = vcvt.s32.f32 %v1471_v19  ;;  %v1488_v5 = vcvt.s32.f32 %v1486_v1  ;;  %v1472_v8 = vcvt.s32.f32 %v1470_v6 }
 0xbf4   : > { %v2000_v20 = vpop.eup %1999  ;;  %1474 = vmin.xlane.f32.xlu0 %v1473_v56 }
 0xbf5   : > { %v1523_v62 = vmul.f32 %v2000_v20, %v1986_v32 }
 0xbf7   : > { %v1531_v21 = vmax.f32 %v1523_v62, 1.1920929e-07 }
 0xbf8   : > { %1489 = vmin.xlane.f32.xlu0 %v1488_v5 }
 0xbf9   : > { %v1533_v11 = vmin.f32 %v1531_v21, 0.9999999 }
 0xbfb   : > { %2001 = vlog2.f32 %v1533_v11 }
 0xbfc   : > { %2003 = vrcp.f32 %v1101_v23 }
 0xc05   : > { %v2002_v16 = vpop.eup %2001 }
 0xc06   : > { %v1537_v27 = vmul.f32 0.6931472, %v2002_v16  ;;  %v2004_v38 = vpop.eup %2003 }
 0xc07   : > { %v1105_v39 = vmul.f32 %v2004_v38, %v2598_v46  ;;  %v1580_v38 = vsel %vm1574_vm15, %v2466_v24, %v2526_v36 }
 0xc08   : > { %v1557_v22 = vmul.f32 %v1537_v27, %v1523_v62 }
 0xc09   : > { %v1113_v40 = vmax.f32 %v1105_v39, 1.1920929e-07 }
 0xc0a   : > { %1562 = vrot.lane.b32.xlu1 %v1557_v22, %s2122_s28 }
 0xc0b   : > { %v1115_v47 = vmin.f32 %v1113_v40, 0.9999999 }
 0xc1e   : > { %v1098_v25 = vpop.xlane.xlu1 %1097 }
 0xc1f   : > { %2005 = vrcp.f32 %v1098_v25 }
 0xc20   : > { %2007 = vlog2.f32 %v1115_v47 }
 0xc27   : > { %v1342_v15 = vpop.permute.xlu1 %1341 }
 0xc29   : > { %v2006_v42 = vpop.eup %2005 }
 0xc2a   : > { %v1104_v32 = vmul.f32 %v2006_v42, %v1994_v3  ;;  %v2008_v49 = vpop.eup %2007 }
 0xc2b   : > { %v1119_v50 = vmul.f32 0.6931472, %v2008_v49  ;;  %v1320_v19 = vpop.permute.xlu1 %1319 }
 0xc2c   : > { %v1112_v28 = vmax.f32 %v1104_v32, 1.1920929e-07  ;;  %v1325_v1 = vmul.f32 %v2537_v43, %v1320_v19 }
 0xc2d   : > { %v1121_v58 = vmul.f32 %v2478_v35, %v1119_v50 }
 0xc2e   : > { %v1114_v37 = vmin.f32 %v1112_v28, 0.9999999  ;;  %v1327_v20 = vsel %vm1292_vm4, %v1325_v1, 0.0 }
 0xc2f   : > { %v1125_v46 = vsel %vm1028_vm3, %v1121_v58, 0.0 }
 0xc30   : > { %2009 = vlog2.f32 %v1114_v37 }
 0xc31   : > { %2011 = vrcp.f32 %v1516_v57  ;;  %v1487_v57 = vcvt.s32.f32 %v1485_v53 }
 0xc3a   : > { %v2010_v55 = vpop.eup %2009 }
 0xc3b   : > { %v1117_v60 = vmul.f32 0.6931472, %v2010_v55  ;;  %v2012_v29 = vpop.eup %2011 }
 0xc3c   : > { %v1522_v63 = vmul.f32 %v2012_v29, %v2590_v30 }
 0xc3d   : > { %v1120_v52 = vmul.f32 %v2473_v34, %v1117_v60  ;;  %v1130_v59 = vmul.f32 %v1117_v60, %v1104_v32  ;;  %v1131_v34 = vmul.f32 %v1119_v50, %v1105_v39  ;;  %v1581_v60 = vsel %vm1574_vm15, %v2470_v33, %v2530_v41 }
 0xc3e   : > { %v1530_v3 = vmax.f32 %v1522_v63, 1.1920929e-07 }
 0xc3f   : > { %v1122_v54 = vsel %vm1028_vm3, %v1120_v52, 0.0  ;;  %v1132_v61 = vsel %vm1028_vm3, %v1130_v59, 0.0  ;;  %v1135_v4 = vsel %vm1028_vm3, %v1131_v34, 0.0 }
 0xc40   : > { %1123 = vadd.xlane.f32.xlu0 %v1122_v54  ;;  %v1532_v35 = vmin.f32 %v1530_v3, 0.9999999 }
 0xc42   : > { %2013 = vlog2.f32 %v1532_v35 }
 0xc44   : > { %1126 = vadd.xlane.f32.xlu0 %v1125_v46 }
 0xc48   : > { %1133 = vadd.xlane.f32.xlu0 %v1132_v61 }
 0xc4c   : > { %v2014_v10 = vpop.eup %2013 }
 0xc4d   : > { %v1535_v12 = vmul.f32 0.6931472, %v2014_v10 }
 0xc5e   : > { %1339 = vrot.lane.b32.xlu0 %v2608_v2, %s2121_s20  ;;  %v1556_v2 = vmul.f32 %v1535_v12, %v1522_v63 }
 0xc7d   : > { %1136 = vadd.xlane.f32.xlu0 %v1135_v4 }
 0xc81   : > { %v1475_v7 = vpop.xlane.xlu0 %1474 }
 0xc82   : > { %vm1476_vm2 = vcmp.eq.f32.partialorder %v1473_v56, %v1475_v7  ;;  %v1481_v21 = vcvt.f32.s32 %v1475_v7 }
 0xc83   : > { %v1477_v9 = vsel %vm1476_vm2, %v1472_v8, inf }
 0xc84   : > { %1478 = vmin.xlane.f32.xlu1 %v1477_v9  ;;  %v1482_v22 = vshll.u32 %v1481_v21, 16 }
 0xc85   : > { %v1490_v30 = vpop.xlane.xlu0 %1489 }
 0xc86   : > { %vm1491_vm14 = vcmp.eq.f32.partialorder %v1488_v5, %v1490_v30  ;;  %v1563_v5 = vpop.permute.xlu1 %1562  ;;  %v1496_v28 = vcvt.f32.s32 %v1490_v30 }
 0xc87   : > { %v1492_v0 = vsel %vm1491_vm14, %v1487_v57, inf  ;;  %v1569_v43 = vsel %vm1513_vm5, %v1563_v5, 0.0 }
 0xc88   : > { %v1497_v24 = vshll.u32 %v1496_v28, 16 }
 0xc93   : > { %1560 = vrot.lane.b32.xlu0 %v1556_v2, %s2122_s28 }
 0xc95   : > { %1540 = vrot.lane.b32.xlu1 %v1535_v12, %s2122_s28 }
 0xcb2   : > { %1493 = vmin.xlane.f32.xlu0 %v1492_v0 }
 0xcc8   : > { %1321 = vrot.lane.b32.xlu0 %v2611_v13, %s2121_s20  ;;  %v1348_v13 = vsel %vm1292_vm4, %v1342_v15, 0.0  ;;  %s2124_s20 = smov [#allocation5]  }
 0xccc   : > { %1542 = vrot.lane.b32.xlu0 %v1537_v27, %s2122_s28 }
 0xccd   : > { %v2641_v14 = vpop.xlane.xlu0 %1123 }
 0xcd1   : > { %v2643_v26 = vpop.xlane.xlu0 %1126 }
 0xcd5   : > { %v1134_v17 = vpop.xlane.xlu0 %1133 }
 0xcd6   : > { %v1138_v33 = vsub.f32 0.0, %v1134_v17 }
 0xcd9   : > { %v1340_v56 = vpop.permute.xlu0 %1339 }
 0xcda   : > { %v1345_v18 = vsel %vm1292_vm4, %v1340_v56, 0.0 }
 0xcdb   : > { %1346 = vadd.xlane.f32.xlu1 %v1345_v18 }
 0xcdf   : > { %1328 = vadd.xlane.f32.xlu1 %v1327_v20 }
 0xceb   : > { %1349 = vadd.xlane.f32.xlu0 %v1348_v13 }
 0xd0a   : > { %v1137_v62 = vpop.xlane.xlu0 %1136 }
 0xd0b   : > { %v1139_v3 = vsub.f32 0.0, %v1137_v62 }
 0xd0e   : > { %v1561_v11 = vpop.permute.xlu0 %1560 }
 0xd0f   : > { %v1566_v16 = vsel %vm1513_vm5, %v1561_v11, 0.0 }
 0xd10   : > { %1567 = vadd.xlane.f32.xlu0 %v1566_v16 }
 0xd11   : > { %v1479_v27 = vpop.xlane.xlu1 %1478 }
 0xd12   : > { %v1480_v23 = vcvt.f32.s32 %v1479_v27 }
 0xd14   : > { %v1483_v25 = vadd.s32 %v1482_v22, %v1480_v23  ;;  %1570 = vadd.xlane.f32.xlu0 %v1569_v43 }
 0xd15   : > { %v1541_v42 = vpop.permute.xlu1 %1540 }
 0xd16   : > { %vm1524_vm1 = vcmp.eq.s32.totalorder %v2416_v45, %v1483_v25  ;;  %v1582_v39 = vsel %vm1577_vm0, %v1580_v38, %v1483_v25 }
 0xd17   : > { %v1795_v40 = vsel %vm1524_vm1, 1.0, %v2115_v31  ;;  %v1584_v6 = vcvt.s32.f32 %v1582_v39 }
 0xd18   : > { %v1546_v32 = vmul.f32 %v1795_v40, %v1541_v42 }
 0xd1a   : > { %v1548_v47 = vsel %vm1513_vm5, %v1546_v32, 0.0 }
 0xd1b   : > { %1549 = vadd.xlane.f32.xlu1 %v1548_v47 }
 0xd2c   : > { %1596 = vrot.lane.b32.xlu1 %v2430_v48, %s2122_s28 }
 0xd30   : > { %1598 = vrot.lane.b32.xlu1 %v2434_v51, %s2122_s28  ;;  %s2047_s28 = sshll.u32 %s2124_s20, 4  ;;  %s2048_s28 = int_to_ptr.vmem [resolvable:$false] %s2047_s28 }
 0xd31   : > { %p2050_p2 = scmp.lt.s32.totalorder %s2686_s30, %s2048_s28 }
 0xd3f   : > { %v1494_v37 = vpop.xlane.xlu0 %1493 }
 0xd40   : > { %v1495_v36 = vcvt.f32.s32 %v1494_v37 }
 0xd42   : > { %v1498_v49 = vadd.s32 %v1497_v24, %v1495_v36 }
 0xd43   : > { %v1322_v55 = vpop.permute.xlu0 %1321 }
 0xd44   : > { %v1326_v50 = vmul.f32 %v2540_v44, %v1322_v55  ;;  %vm1525_vm6 = vcmp.eq.s32.totalorder %v2416_v45, %v1498_v49  ;;  %v1583_v52 = vsel %vm1577_vm0, %v1581_v60, %v1498_v49 }
 0xd45   : > { %v1796_v51 = vsel %vm1525_vm6, 1.0, %v2115_v31  ;;  %v1585_v8 = vcvt.s32.f32 %v1583_v52 }
 0xd46   : > { %v1330_v48 = vsel %vm1292_vm4, %v1326_v50, 0.0 }
 0xd47   : > { %v1543_v54 = vpop.permute.xlu0 %1542  ;;  %1331 = vadd.xlane.f32.xlu0 %v1330_v48 }
 0xd48   : > { %v1547_v58 = vmul.f32 %v1796_v51, %v1543_v54 }
 0xd4a   : > { %v1551_v46 = vsel %vm1513_vm5, %v1547_v58, 0.0 }
 0xd4b   : > { %1552 = vadd.xlane.f32.xlu0 %v1551_v46 }
 0xd68   : > { %v1347_v59 = vpop.xlane.xlu1 %1346 }
 0xd69   : > { %v1351_v29 = vsub.f32 0.0, %v1347_v59 }
 0xd6b   : > { %v1575_v45 = vsel %vm1574_vm15, %v1138_v33, %v1351_v29 }
 0xd6c   : > { %v1329_v9 = vpop.xlane.xlu1 %1328 }
 0xd6d   : > { %v1333_v53 = vadd.f32 %v1329_v9, %v2641_v14 }
 0xd78   : > { %v1350_v61 = vpop.xlane.xlu0 %1349 }
 0xd79   : > { %v1352_v63 = vsub.f32 0.0, %v1350_v61 }
 0xd7b   : > { %v1576_v35 = vsel %vm1574_vm15, %v1139_v3, %v1352_v63 }
 0xd9d   : > { %v1568_v41 = vpop.xlane.xlu0 %1567 }
 0xd9e   : > { %v1572_v44 = vsub.f32 0.0, %v1568_v41 }
 0xda0   : > { %v1578_v34 = vsel %vm1577_vm0, %v1575_v45, %v1572_v44 }
 0xda1   : > { %v1571_v4 = vpop.xlane.xlu0 %1570  ;;  %1588 = vrot.lane.b32.xlu1 %v1578_v34, %s2123_s29 }
 0xda2   : > { %v1573_v31 = vsub.f32 0.0, %v1571_v4 }
 0xda4   : > { %v1579_v7 = vsel %vm1577_vm0, %v1576_v35, %v1573_v31 }
 0xda5   : > { %1590 = vrot.lane.b32.xlu0 %v1579_v7, %s2123_s29  ;;  %1604 = vrot.lane.b32.xlu1 %v1584_v6, %s2119_s15  ;;  %s2049_s29 = scalar_lea.vmem %s2048_s28, 512 }
 0xda6   : > { %p2051_p3 = scmp.lt.s32.totalorder %s2049_s29, %s2043_s16 }
 0xda8   : > { %v1550_v10 = vpop.xlane.xlu1 %1549  ;;  %p2052_p4 = por %p2051_p3, %p2050_p2 }
 0xda9   : > { %1606 = vrot.lane.b32.xlu0 %v1585_v8, %s2119_s15  ;;  %v1554_v57 = vadd.f32 %v1550_v10, %v1333_v53 }
 0xdaa   : > { %p2053_p7 = pnand %p2052_p4, %p2046_p12 }
 0xdac   : > { %v1597_v12 = vpop.permute.xlu1 %1596 }
 0xdb0   : > { %v1599_v30 = vpop.permute.xlu1 %1598 }
 0xdd4   : > { %v1332_v2 = vpop.xlane.xlu0 %1331 }
 0xdd5   : > { %v1334_v17 = vadd.f32 %v1332_v2, %v2643_v26 }
 0xdd8   : > { %v1553_v0 = vpop.xlane.xlu0 %1552 }
 0xdd9   : > { %v1555_v56 = vadd.f32 %v1553_v0, %v1334_v17 }
 0xe13   : > { %v1589_v15 = vpop.permute.xlu1 %1588 }
 0xe14   : > { %v1610_v19 = vsel %vm1574_vm15, %v1554_v57, %v1589_v15 }
 0xe15   : > { %v1612_v18 = vsel %vm1513_vm5, %v1610_v19, %v1597_v12 }
 0xe17   : > { %v1591_v1 = vpop.permute.xlu0 %1590  ;;  %v1605_v20 = vpop.permute.xlu1 %1604 }
 0xe18   : > { %v1611_v13 = vsel %vm1574_vm15, %v1555_v56, %v1591_v1  ;;  %v1614_v14 = vsel %vm1028_vm3, %v1612_v18, %v1605_v20 }
 0xe19   : > { %v1616_v62 = vsel %vm1369_vm11, %v1614_v14, 0.0  ;;  %v1613_v5 = vsel %vm1513_vm5, %v1611_v13, %v1599_v30 }
 0xe1a   : > { %1618 = vst [vmem:[%s438_s27] sm:$0xff] %v1616_v62 }
 0xe1b   : > { %v1607_v26 = vpop.permute.xlu0 %1606 }
 0xe1c   : > { %v1615_v21 = vsel %vm1028_vm3, %v1613_v5, %v1607_v26 }
 0xe1d   : > { %v1617_v11 = vsel %vm1369_vm11, %v1615_v21, 0.0 }
 0xe1e   : > { %1619 = vst [vmem:[%s438_s27 + $0x8] sm:$0xff] %v1617_v11 }
 0xe1f   : > { %2056 = shalt.err (!%p2053_p7)
}
 0xe20   : > { %s2057_s23 = scalar_lea.hbm %s2693_s26, 256  ;;  %s2061_s17 = scalar_lea.hbm %s2750_s12, 512 }
 0xe21   : > { %p2058_p8 = scmp.ne.s32.totalorder %s2693_s26, %s2057_s23  ;;  %p2062_p1 = scmp.lt.u32.totalorder %s2693_s26, %s2750_s12 }
 0xe22   : > { %p2063_p0 = scmp.lt.u32.totalorder %s2061_s17, %s2057_s23  ;;  %p2065_p6 = scmp.lt.u32.totalorder %s2057_s23, %s2693_s26 }
 0xe23   : > { %p2059_p11 = pnand %p2058_p8, %p2769_p9 }
 0xe24   : > { %p2064_p5 = por %p2063_p0, %p2062_p1 }
 0xe25   : > { %p2060_p13 = pneg %p2059_p11 }
 0xe26   : > { %p2066_p10 = por %p2065_p6, %p2064_p5 }
 0xe28   : > { %p2067_p12 = pnand %p2066_p10, %p2060_p13 }
 0xe2a   : > { %2070 = shalt.err (!%p2067_p12)
}
 0xe2b   : > { %s2125_s16 = smov 128  }
 0xe2c   : > { %1852 = dma.vmem_to_hbm [thread:$0]  (%p2769_p9), %s2686_s30, 256, %s2693_s26, %s2696_s25, %s2125_s16, %s2125_s16, %s2120_s19  }
 0xe2d PF: > { %p1864_p2 = scmp.ge.s32.totalorder %s2109_s24, 2  ;;  %s1649_s20 = sand.u32 1, %s2097_s21  }
 0xe2e   : > { %p2770_p3 = scmp.ne.s32.totalorder %s2762_s14, 0  ;;  %s1650_s28 = scalar_lea.sflag [#allocation4], %s1649_s20 }
 0xe30   : > { %p1859_p4 = pnand %p1864_p2, %p2770_p3 }
 0xe32   : > { %2092 = dma.done.wait (!%p1859_p4), %s1650_s28, 256  }
 0xe33   : > { %2094 = vsyncadd (!%p1859_p4), %s1650_s28, 4294967040  ;;  %s2771_s24 = sld [smem:[#allocation9_spill]]  ;;  %s2772_s29 = sld [smem:[#allocation8_spill]] }
 0xe34   : > { %s2773_s23 = sld [smem:[#allocation10_spill]]  ;;  %s2774_s21 = smov %s2101_s22 }
 0xe39   : > { %p23_p7 = scmp.ge.s32.totalorder %s2771_s24, 4   ;;  %s2775_s22 = smov %s2772_s29 }
 0xe3b   :  { %25 = sbr.rel (!%p23_p7) target bundleno = 6 (0x6), region = 111 }
 0xe42   :  { %1655 = vsyncpa [#allocation3], 1 }
 0xe43   :  { %1657 = vsyncpa [#allocation3 + $0x1], 1 }
 0xe44   :  { %1658 = vsyncpa [#allocation4], 1 }
 0xe45   :  { %1660 = vsyncpa [#allocation4 + $0x1], 1 }

</bundles_post_ra>
